<compile_context>
chip_gen: v7x
topology: tpu7x:2x2x1
jax: 0.10.0
libtpu: 0.0.40
codegen_flags: <defaults>
</compile_context>

<pallas_src>
from functools import partial

import jax
import jax.numpy as jnp
import numpy as np
from jax.experimental import pallas as pl
from jax.experimental.pallas import tpu as pltpu


def _transformer_kernel(q_ref, k_ref, v_ref,
                        wq_ref, wk_ref, wv_ref,
                        bq_ref, bk_ref, bv_ref,
                        wo_ref, bo_ref,
                        g1_ref, be1_ref, g2_ref, be2_ref,
                        w1_ref, b1_ref, w2_ref, b2_ref,
                        out_ref, attn_ref=None,
                        *, num_heads, nb, L, S):
    E = q_ref.shape[-1]
    D = E // num_heads

    qf = q_ref[...]                      # (nb*L, E)  -- whole chunk, batch-major
    kf = k_ref[...]                      # (nb*S, E)
    vf = v_ref[...]                      # (nb*S, E)

    # In-projections as single big matmuls over the flattened chunk.
    # (1/sqrt(D) is already folded into wq/bq by the wrapper.)
    qp = jnp.dot(qf, wq_ref[...], preferred_element_type=jnp.float32) + bq_ref[...]
    kp = jnp.dot(kf, wk_ref[...], preferred_element_type=jnp.float32) + bk_ref[...]
    vp = jnp.dot(vf, wv_ref[...], preferred_element_type=jnp.float32) + bv_ref[...]

    wo = wo_ref[...]                     # (E, E), loaded once

    x = jnp.zeros((nb * L, E), jnp.float32)          # out-proj accumulator
    attn_acc = jnp.zeros((nb, L, S), jnp.float32)

    # Per-head loop (num_heads is small & static); each head's score / softmax /
    # PV is batched over the nb sequences with 3-D einsums.
    for h in range(num_heads):
        lo = h * D
        qh = qp[:, lo:lo + D].reshape(nb, L, D)       # leading-dim split: free
        kh = kp[:, lo:lo + D].reshape(nb, S, D)
        vh = vp[:, lo:lo + D].reshape(nb, S, D)

        s = jnp.einsum('nld,nsd->nls', qh, kh,
                       preferred_element_type=jnp.float32)
        s = s - jnp.max(s, axis=-1, keepdims=True)
        p = jnp.exp(s)
        inv = pl.reciprocal(jnp.sum(p, axis=-1, keepdims=True), approx=False)
        p = p * inv

        if attn_ref is not None:
            attn_acc = attn_acc + p

        oh = jnp.einsum('nls,nsd->nld', p, vh,
                        preferred_element_type=jnp.float32)     # (nb, L, D)
        # Fold this head's slice of the out-projection; avoids lane-concat.
        x = x + jnp.dot(oh.reshape(nb * L, D), wo[lo:lo + D, :],
                        preferred_element_type=jnp.float32)

    if attn_ref is not None:
        attn_ref[...] = attn_acc * (1.0 / float(num_heads))      # head-averaged

    x = x + bo_ref[...]

    # dropout1: identity (eval mode)
    # layer_norm1
    mu = jnp.mean(x, axis=-1, keepdims=True)
    xc = x - mu
    var = jnp.mean(xc * xc, axis=-1, keepdims=True)
    x1 = xc * jax.lax.rsqrt(var + 1e-5) * g1_ref[...] + be1_ref[...]

    # MLP: Linear -> ReLU -> (Dropout=identity) -> Linear, on the full slab
    h1 = jnp.dot(x1, w1_ref[...], preferred_element_type=jnp.float32) + b1_ref[...]
    h1 = jnp.maximum(h1, 0.0)
    h2 = jnp.dot(h1, w2_ref[...], preferred_element_type=jnp.float32) + b2_ref[...]

    # residual (dropout2 identity) + layer_norm2
    y = x1 + h2
    mu2 = jnp.mean(y, axis=-1, keepdims=True)
    yc = y - mu2
    var2 = jnp.mean(yc * yc, axis=-1, keepdims=True)
    y2 = yc * jax.lax.rsqrt(var2 + 1e-5) * g2_ref[...] + be2_ref[...]

    out_ref[...] = y2.reshape(nb, L, E)               # leading-dim split: free


def module_transformer_forward(q, k, v, params, *, num_heads,
                               need_weights=True, batch_chunk=None):
    """q, k, v: (L, N, E) float32 — PyTorch MultiheadAttention convention.

    Returns (x_attend (L, N, E), attn_matrix (N, L, S) or None).
    """
    L, N, E = q.shape
    S = k.shape[0]
    assert E % num_heads == 0, "embed dim must be divisible by num_heads"
    D = E // num_heads

    nb = N if batch_chunk is None else batch_chunk    # batch elems per grid step
    assert N % nb == 0, "batch_chunk must divide the batch size"
    num_chunks = N // nb

    # Batch-major + flatten to a 2-D slab.  These are tiny one-shot XLA ops
    # here; at scale keep activations batch-major end-to-end instead.
    qf = jnp.transpose(q, (1, 0, 2)).reshape(N * L, E)
    kf = jnp.transpose(k, (1, 0, 2)).reshape(N * S, E)
    vf = jnp.transpose(v, (1, 0, 2)).reshape(N * S, E)

    # Fold the 1/sqrt(D) attention scale into the q projection (trace-time).
    scale = 1.0 / float(np.sqrt(D))
    p = params
    wq_s = p["wq"] * scale
    bq_s = p["bq"] * scale

    param_args = (wq_s, p["wk"], p["wv"], bq_s, p["bk"], p["bv"],
                  p["wo"], p["bo"],
                  p["ln1_g"], p["ln1_b"], p["ln2_g"], p["ln2_b"],
                  p["w_mlp1"], p["b_mlp1"], p["w_mlp2"], p["b_mlp2"])

    def full_spec(a):
        nd = a.ndim
        return pl.BlockSpec(a.shape, lambda c, _nd=nd: (0,) * _nd)

    in_specs = [pl.BlockSpec((nb * L, E), lambda c: (c, 0)),
                pl.BlockSpec((nb * S, E), lambda c: (c, 0)),
                pl.BlockSpec((nb * S, E), lambda c: (c, 0))]
    in_specs += [full_spec(a) for a in param_args]

    if need_weights:
        out_shape = (jax.ShapeDtypeStruct((N, L, E), jnp.float32),
                     jax.ShapeDtypeStruct((N, L, S), jnp.float32))
        out_specs = (pl.BlockSpec((nb, L, E), lambda c: (c, 0, 0)),
                     pl.BlockSpec((nb, L, S), lambda c: (c, 0, 0)))
    else:
        out_shape = jax.ShapeDtypeStruct((N, L, E), jnp.float32)
        out_specs = pl.BlockSpec((nb, L, E), lambda c: (c, 0, 0))

    kernel = partial(_transformer_kernel, num_heads=num_heads, nb=nb, L=L, S=S)

    result = pl.pallas_call(
        kernel,
        out_shape=out_shape,
        grid=(num_chunks,),
        in_specs=in_specs,
        out_specs=out_specs,
        compiler_params=pltpu.CompilerParams(
            dimension_semantics=("parallel",)),   # shards chunks across TCs on v7x
    )(qf, kf, vf, *param_args)

    if need_weights:
        out, attn = result
    else:
        out, attn = result, None

    x_attend = jnp.transpose(out, (1, 0, 2))          # back to PyTorch (L, N, E)
    return x_attend, attn


def make_params(key, n_region, hidden_dim):
    E, H = n_region, hidden_dim
    ks = jax.random.split(key, 8)
    scale = 1.0 / np.sqrt(E)
    # in_proj_weight (3E, E) split into Wq/Wk/Wv; stored transposed for x @ W
    wq = jax.random.normal(ks[0], (E, E), jnp.float32) * scale
    wk = jax.random.normal(ks[1], (E, E), jnp.float32) * scale
    wv = jax.random.normal(ks[2], (E, E), jnp.float32) * scale
    bq = jax.random.normal(ks[3], (1, E), jnp.float32) * 0.02
    bk = jax.random.normal(ks[4], (1, E), jnp.float32) * 0.02
    bv = jax.random.normal(ks[5], (1, E), jnp.float32) * 0.02
    wo = jax.random.normal(ks[6], (E, E), jnp.float32) * scale
    bo = jnp.zeros((1, E), jnp.float32)
    w_mlp1 = jax.random.normal(ks[7], (E, H), jnp.float32) * scale
    b_mlp1 = jnp.zeros((1, H), jnp.float32)
    w_mlp2 = jax.random.normal(jax.random.PRNGKey(123), (H, E), jnp.float32) * (1.0 / np.sqrt(H))
    b_mlp2 = jnp.zeros((1, E), jnp.float32)
    return dict(wq=wq, wk=wk, wv=wv, bq=bq, bk=bk, bv=bv, wo=wo, bo=bo,
                ln1_g=jnp.ones((1, E), jnp.float32), ln1_b=jnp.zeros((1, E), jnp.float32),
                ln2_g=jnp.ones((1, E), jnp.float32), ln2_b=jnp.zeros((1, E), jnp.float32),
                w_mlp1=w_mlp1, b_mlp1=b_mlp1, w_mlp2=w_mlp2, b_mlp2=b_mlp2)


def _reference(q, k, v, p, num_heads):
    """Pure-JAX reference mirroring PyTorch MultiheadAttention + the module."""
    L, N, E = q.shape
    S = k.shape[0]
    D = E // num_heads
    qb = jnp.transpose(q, (1, 0, 2))
    kb = jnp.transpose(k, (1, 0, 2))
    vb = jnp.transpose(v, (1, 0, 2))
    qp = qb @ p["wq"] + p["bq"]
    kp = kb @ p["wk"] + p["bk"]
    vp = vb @ p["wv"] + p["bv"]
    qh = qp.reshape(N, L, num_heads, D).transpose(0, 2, 1, 3)
    kh = kp.reshape(N, S, num_heads, D).transpose(0, 2, 1, 3)
    vh = vp.reshape(N, S, num_heads, D).transpose(0, 2, 1, 3)
    s = jnp.einsum("bhld,bhsd->bhls", qh, kh) / np.sqrt(D)
    w = jax.nn.softmax(s, axis=-1)
    o = jnp.einsum("bhls,bhsd->bhld", w, vh).transpose(0, 2, 1, 3).reshape(N, L, E)
    x = o @ p["wo"] + p["bo"]

    def ln(x, g, b):
        mu = jnp.mean(x, axis=-1, keepdims=True)
        var = jnp.mean((x - mu) ** 2, axis=-1, keepdims=True)
        return (x - mu) / jnp.sqrt(var + 1e-5) * g + b

    x = ln(x, p["ln1_g"], p["ln1_b"])
    h = jnp.maximum(x @ p["w_mlp1"] + p["b_mlp1"], 0.0) @ p["w_mlp2"] + p["b_mlp2"]
    y = ln(x + h, p["ln2_g"], p["ln2_b"])
    return jnp.transpose(y, (1, 0, 2)), jnp.mean(w, axis=1)


if __name__ == "__main__":
    L, N = 8, 2                 # seq len, batch
    n_region = 32               # embed dim (must divide by num_heads)
    hidden_dim = 64
    num_heads = 4

    key = jax.random.PRNGKey(0)
    kq, kk, kv, kp = jax.random.split(key, 4)
    q = jax.random.normal(kq, (L, N, n_region), jnp.float32)
    k = jax.random.normal(kk, (L, N, n_region), jnp.float32)
    v = jax.random.normal(kv, (L, N, n_region), jnp.float32)
    params = make_params(kp, n_region, hidden_dim)

    # Full path (with averaged attention weights, like need_weights=True).
    x_attend, attn_matrix = module_transformer_forward(q, k, v, params,
                                                       num_heads=num_heads,
                                                       need_weights=True)
    jax.block_until_ready((x_attend, attn_matrix))

    x_ref, a_ref = _reference(q, k, v, params, num_heads)
    np.testing.assert_allclose(np.asarray(x_attend), np.asarray(x_ref),
                               rtol=1e-4, atol=1e-4)
    np.testing.assert_allclose(np.asarray(attn_matrix), np.asarray(a_ref),
                               rtol=1e-4, atol=1e-4)

    # Weights-free path (skips attn compute + writeback entirely).
    x_nw, attn_none = module_transformer_forward(q, k, v, params,
                                                 num_heads=num_heads,
                                                 need_weights=False)
    jax.block_until_ready(x_nw)
    assert attn_none is None
    np.testing.assert_allclose(np.asarray(x_nw), np.asarray(x_ref),
                               rtol=1e-4, atol=1e-4)

    print("KERNEL_OK")
</pallas_src>

<mosaic_0001>
module attributes {stable_mosaic.version = 11 : i64} {
  func.func @_transformer_kernel(%arg0: i32, %arg1: memref<16x32xf32, #tpu.memory_space<vmem>>, %arg2: memref<16x32xf32, #tpu.memory_space<vmem>>, %arg3: memref<16x32xf32, #tpu.memory_space<vmem>>, %arg4: memref<32x32xf32, #tpu.memory_space<vmem>>, %arg5: memref<32x32xf32, #tpu.memory_space<vmem>>, %arg6: memref<32x32xf32, #tpu.memory_space<vmem>>, %arg7: memref<1x32xf32, #tpu.memory_space<vmem>>, %arg8: memref<1x32xf32, #tpu.memory_space<vmem>>, %arg9: memref<1x32xf32, #tpu.memory_space<vmem>>, %arg10: memref<32x32xf32, #tpu.memory_space<vmem>>, %arg11: memref<1x32xf32, #tpu.memory_space<vmem>>, %arg12: memref<1x32xf32, #tpu.memory_space<vmem>>, %arg13: memref<1x32xf32, #tpu.memory_space<vmem>>, %arg14: memref<1x32xf32, #tpu.memory_space<vmem>>, %arg15: memref<1x32xf32, #tpu.memory_space<vmem>>, %arg16: memref<32x64xf32, #tpu.memory_space<vmem>>, %arg17: memref<1x64xf32, #tpu.memory_space<vmem>>, %arg18: memref<64x32xf32, #tpu.memory_space<vmem>>, %arg19: memref<1x32xf32, #tpu.memory_space<vmem>>, %arg20: memref<2x8x32xf32, #tpu.memory_space<vmem>>, %arg21: memref<2x8x8xf32, #tpu.memory_space<vmem>>) attributes {dimension_semantics = [#tpu.dimension_semantics<parallel>], iteration_bounds = array<i64: 1>, scalar_prefetch = 0 : i64, scratch_operands = 0 : i64, tpu.core_type = #tpu.core_type<tc>, window_params = [{transform_indices = @transform_0, window_bounds = array<i64: 16, 32>}, {transform_indices = @transform_1, window_bounds = array<i64: 16, 32>}, {transform_indices = @transform_2, window_bounds = array<i64: 16, 32>}, {pipeline_mode = #tpu.pipeline_mode<synchronous>, transform_indices = @transform_3, window_bounds = array<i64: 32, 32>}, {pipeline_mode = #tpu.pipeline_mode<synchronous>, transform_indices = @transform_4, window_bounds = array<i64: 32, 32>}, {pipeline_mode = #tpu.pipeline_mode<synchronous>, transform_indices = @transform_5, window_bounds = array<i64: 32, 32>}, {pipeline_mode = #tpu.pipeline_mode<synchronous>, transform_indices = @transform_6, window_bounds = array<i64: 1, 32>}, {pipeline_mode = #tpu.pipeline_mode<synchronous>, transform_indices = @transform_7, window_bounds = array<i64: 1, 32>}, {pipeline_mode = #tpu.pipeline_mode<synchronous>, transform_indices = @transform_8, window_bounds = array<i64: 1, 32>}, {pipeline_mode = #tpu.pipeline_mode<synchronous>, transform_indices = @transform_9, window_bounds = array<i64: 32, 32>}, {pipeline_mode = #tpu.pipeline_mode<synchronous>, transform_indices = @transform_10, window_bounds = array<i64: 1, 32>}, {pipeline_mode = #tpu.pipeline_mode<synchronous>, transform_indices = @transform_11, window_bounds = array<i64: 1, 32>}, {pipeline_mode = #tpu.pipeline_mode<synchronous>, transform_indices = @transform_12, window_bounds = array<i64: 1, 32>}, {pipeline_mode = #tpu.pipeline_mode<synchronous>, transform_indices = @transform_13, window_bounds = array<i64: 1, 32>}, {pipeline_mode = #tpu.pipeline_mode<synchronous>, transform_indices = @transform_14, window_bounds = array<i64: 1, 32>}, {pipeline_mode = #tpu.pipeline_mode<synchronous>, transform_indices = @transform_15, window_bounds = array<i64: 32, 64>}, {pipeline_mode = #tpu.pipeline_mode<synchronous>, transform_indices = @transform_16, window_bounds = array<i64: 1, 64>}, {pipeline_mode = #tpu.pipeline_mode<synchronous>, transform_indices = @transform_17, window_bounds = array<i64: 64, 32>}, {pipeline_mode = #tpu.pipeline_mode<synchronous>, transform_indices = @transform_18, window_bounds = array<i64: 1, 32>}, {transform_indices = @transform_19, window_bounds = array<i64: 2, 8, 32>}, {transform_indices = @transform_20, window_bounds = array<i64: 2, 8, 8>}]} {
    %c0 = arith.constant 0 : index
    %c0_0 = arith.constant 0 : index
    %0 = vector.load %arg1[%c0, %c0_0] : memref<16x32xf32, #tpu.memory_space<vmem>>, vector<16x32xf32>
    %c0_1 = arith.constant 0 : index
    %c0_2 = arith.constant 0 : index
    %1 = vector.load %arg2[%c0_1, %c0_2] : memref<16x32xf32, #tpu.memory_space<vmem>>, vector<16x32xf32>
    %c0_3 = arith.constant 0 : index
    %c0_4 = arith.constant 0 : index
    %2 = vector.load %arg3[%c0_3, %c0_4] : memref<16x32xf32, #tpu.memory_space<vmem>>, vector<16x32xf32>
    %c0_5 = arith.constant 0 : index
    %c0_6 = arith.constant 0 : index
    %3 = vector.load %arg4[%c0_5, %c0_6] : memref<32x32xf32, #tpu.memory_space<vmem>>, vector<32x32xf32>
    %cst = arith.constant dense<0.000000e+00> : vector<16x32xf32>
    %4 = tpu.matmul %0, %3, %cst {dimension_numbers = #tpu.dot_dimension_numbers<[1], [0], [0], [1], [0, 0, 1, 1], [], []>} : vector<16x32xf32>, vector<32x32xf32>, vector<16x32xf32> -> vector<16x32xf32>
    %c0_7 = arith.constant 0 : index
    %c0_8 = arith.constant 0 : index
    %5 = vector.load %arg7[%c0_7, %c0_8] : memref<1x32xf32, #tpu.memory_space<vmem>>, vector<1x32xf32>
    %6 = vector.broadcast %5 : vector<1x32xf32> to vector<16x32xf32>
    %7 = arith.addf %4, %6 : vector<16x32xf32>
    %c0_9 = arith.constant 0 : index
    %c0_10 = arith.constant 0 : index
    %8 = vector.load %arg5[%c0_9, %c0_10] : memref<32x32xf32, #tpu.memory_space<vmem>>, vector<32x32xf32>
    %cst_11 = arith.constant dense<0.000000e+00> : vector<16x32xf32>
    %9 = tpu.matmul %1, %8, %cst_11 {dimension_numbers = #tpu.dot_dimension_numbers<[1], [0], [0], [1], [0, 0, 1, 1], [], []>} : vector<16x32xf32>, vector<32x32xf32>, vector<16x32xf32> -> vector<16x32xf32>
    %c0_12 = arith.constant 0 : index
    %c0_13 = arith.constant 0 : index
    %10 = vector.load %arg8[%c0_12, %c0_13] : memref<1x32xf32, #tpu.memory_space<vmem>>, vector<1x32xf32>
    %11 = vector.broadcast %10 : vector<1x32xf32> to vector<16x32xf32>
    %12 = arith.addf %9, %11 : vector<16x32xf32>
    %c0_14 = arith.constant 0 : index
    %c0_15 = arith.constant 0 : index
    %13 = vector.load %arg6[%c0_14, %c0_15] : memref<32x32xf32, #tpu.memory_space<vmem>>, vector<32x32xf32>
    %cst_16 = arith.constant dense<0.000000e+00> : vector<16x32xf32>
    %14 = tpu.matmul %2, %13, %cst_16 {dimension_numbers = #tpu.dot_dimension_numbers<[1], [0], [0], [1], [0, 0, 1, 1], [], []>} : vector<16x32xf32>, vector<32x32xf32>, vector<16x32xf32> -> vector<16x32xf32>
    %c0_17 = arith.constant 0 : index
    %c0_18 = arith.constant 0 : index
    %15 = vector.load %arg9[%c0_17, %c0_18] : memref<1x32xf32, #tpu.memory_space<vmem>>, vector<1x32xf32>
    %16 = vector.broadcast %15 : vector<1x32xf32> to vector<16x32xf32>
    %17 = arith.addf %14, %16 : vector<16x32xf32>
    %c0_19 = arith.constant 0 : index
    %c0_20 = arith.constant 0 : index
    %18 = vector.load %arg10[%c0_19, %c0_20] : memref<32x32xf32, #tpu.memory_space<vmem>>, vector<32x32xf32>
    %cst_21 = arith.constant 0.000000e+00 : f32
    %19 = vector.broadcast %cst_21 : f32 to vector<16x32xf32>
    %cst_22 = arith.constant 0.000000e+00 : f32
    %20 = vector.broadcast %cst_22 : f32 to vector<2x8x8xf32>
    %21 = vector.extract_strided_slice %7 {offsets = [0, 0], sizes = [16, 8], strides = [1, 1]} : vector<16x32xf32> to vector<16x8xf32>
    %22 = vector.shape_cast %21 : vector<16x8xf32> to vector<2x8x8xf32>
    %23 = vector.extract_strided_slice %12 {offsets = [0, 0], sizes = [16, 8], strides = [1, 1]} : vector<16x32xf32> to vector<16x8xf32>
    %24 = vector.shape_cast %23 : vector<16x8xf32> to vector<2x8x8xf32>
    %25 = vector.extract_strided_slice %17 {offsets = [0, 0], sizes = [16, 8], strides = [1, 1]} : vector<16x32xf32> to vector<16x8xf32>
    %26 = vector.shape_cast %25 : vector<16x8xf32> to vector<2x8x8xf32>
    "tpu.trace_start"() <{level = 10 : i32, message = "nld,nsd->nls"}> : () -> ()
    %cst_23 = arith.constant dense<0.000000e+00> : vector<2x8x8xf32>
    %27 = tpu.matmul %22, %24, %cst_23 {dimension_numbers = #tpu.dot_dimension_numbers<[2], [2], [1], [1], [0, 0, 0, 1, 1, 1], [0], [0]>} : vector<2x8x8xf32>, vector<2x8x8xf32>, vector<2x8x8xf32> -> vector<2x8x8xf32>
    "tpu.trace_stop"() : () -> ()
    %cst_24 = arith.constant dense<0xFF800000> : vector<2x8xf32>
    %28 = vector.multi_reduction <maximumf>, %27, %cst_24 [2] : vector<2x8x8xf32> to vector<2x8xf32>
    %29 = vector.shape_cast %28 : vector<2x8xf32> to vector<2x8x1xf32>
    %30 = vector.broadcast %29 : vector<2x8x1xf32> to vector<2x8x8xf32>
    %31 = arith.subf %27, %30 : vector<2x8x8xf32>
    %32 = math.exp %31 : vector<2x8x8xf32>
    %cst_25 = arith.constant dense<0.000000e+00> : vector<2x8xf32>
    %33 = vector.multi_reduction <add>, %32, %cst_25 [2] : vector<2x8x8xf32> to vector<2x8xf32>
    %34 = vector.shape_cast %33 : vector<2x8xf32> to vector<2x8x1xf32>
    %35 = tpu.reciprocal %34 : vector<2x8x1xf32> -> vector<2x8x1xf32>
    %36 = vector.broadcast %35 : vector<2x8x1xf32> to vector<2x8x8xf32>
    %37 = arith.mulf %32, %36 : vector<2x8x8xf32>
    %38 = arith.addf %20, %37 : vector<2x8x8xf32>
    "tpu.trace_start"() <{level = 10 : i32, message = "nls,nsd->nld"}> : () -> ()
    %cst_26 = arith.constant dense<0.000000e+00> : vector<2x8x8xf32>
    %39 = tpu.matmul %37, %26, %cst_26 {dimension_numbers = #tpu.dot_dimension_numbers<[2], [1], [1], [2], [0, 0, 0, 1, 1, 2], [0], [0]>} : vector<2x8x8xf32>, vector<2x8x8xf32>, vector<2x8x8xf32> -> vector<2x8x8xf32>
    "tpu.trace_stop"() : () -> ()
    %40 = vector.shape_cast %39 : vector<2x8x8xf32> to vector<16x8xf32>
    %41 = vector.extract_strided_slice %18 {offsets = [0, 0], sizes = [8, 32], strides = [1, 1]} : vector<32x32xf32> to vector<8x32xf32>
    %cst_27 = arith.constant dense<0.000000e+00> : vector<16x32xf32>
    %42 = tpu.matmul %40, %41, %cst_27 {dimension_numbers = #tpu.dot_dimension_numbers<[1], [0], [0], [1], [0, 0, 1, 1], [], []>} : vector<16x8xf32>, vector<8x32xf32>, vector<16x32xf32> -> vector<16x32xf32>
    %43 = arith.addf %19, %42 : vector<16x32xf32>
    %44 = vector.extract_strided_slice %7 {offsets = [0, 8], sizes = [16, 8], strides = [1, 1]} : vector<16x32xf32> to vector<16x8xf32>
    %45 = vector.shape_cast %44 : vector<16x8xf32> to vector<2x8x8xf32>
    %46 = vector.extract_strided_slice %12 {offsets = [0, 8], sizes = [16, 8], strides = [1, 1]} : vector<16x32xf32> to vector<16x8xf32>
    %47 = vector.shape_cast %46 : vector<16x8xf32> to vector<2x8x8xf32>
    %48 = vector.extract_strided_slice %17 {offsets = [0, 8], sizes = [16, 8], strides = [1, 1]} : vector<16x32xf32> to vector<16x8xf32>
    %49 = vector.shape_cast %48 : vector<16x8xf32> to vector<2x8x8xf32>
    "tpu.trace_start"() <{level = 10 : i32, message = "nld,nsd->nls"}> : () -> ()
    %cst_28 = arith.constant dense<0.000000e+00> : vector<2x8x8xf32>
    %50 = tpu.matmul %45, %47, %cst_28 {dimension_numbers = #tpu.dot_dimension_numbers<[2], [2], [1], [1], [0, 0, 0, 1, 1, 1], [0], [0]>} : vector<2x8x8xf32>, vector<2x8x8xf32>, vector<2x8x8xf32> -> vector<2x8x8xf32>
    "tpu.trace_stop"() : () -> ()
    %cst_29 = arith.constant dense<0xFF800000> : vector<2x8xf32>
    %51 = vector.multi_reduction <maximumf>, %50, %cst_29 [2] : vector<2x8x8xf32> to vector<2x8xf32>
    %52 = vector.shape_cast %51 : vector<2x8xf32> to vector<2x8x1xf32>
    %53 = vector.broadcast %52 : vector<2x8x1xf32> to vector<2x8x8xf32>
    %54 = arith.subf %50, %53 : vector<2x8x8xf32>
    %55 = math.exp %54 : vector<2x8x8xf32>
    %cst_30 = arith.constant dense<0.000000e+00> : vector<2x8xf32>
    %56 = vector.multi_reduction <add>, %55, %cst_30 [2] : vector<2x8x8xf32> to vector<2x8xf32>
    %57 = vector.shape_cast %56 : vector<2x8xf32> to vector<2x8x1xf32>
    %58 = tpu.reciprocal %57 : vector<2x8x1xf32> -> vector<2x8x1xf32>
    %59 = vector.broadcast %58 : vector<2x8x1xf32> to vector<2x8x8xf32>
    %60 = arith.mulf %55, %59 : vector<2x8x8xf32>
    %61 = arith.addf %38, %60 : vector<2x8x8xf32>
    "tpu.trace_start"() <{level = 10 : i32, message = "nls,nsd->nld"}> : () -> ()
    %cst_31 = arith.constant dense<0.000000e+00> : vector<2x8x8xf32>
    %62 = tpu.matmul %60, %49, %cst_31 {dimension_numbers = #tpu.dot_dimension_numbers<[2], [1], [1], [2], [0, 0, 0, 1, 1, 2], [0], [0]>} : vector<2x8x8xf32>, vector<2x8x8xf32>, vector<2x8x8xf32> -> vector<2x8x8xf32>
    "tpu.trace_stop"() : () -> ()
    %63 = vector.shape_cast %62 : vector<2x8x8xf32> to vector<16x8xf32>
    %64 = vector.extract_strided_slice %18 {offsets = [8, 0], sizes = [8, 32], strides = [1, 1]} : vector<32x32xf32> to vector<8x32xf32>
    %cst_32 = arith.constant dense<0.000000e+00> : vector<16x32xf32>
    %65 = tpu.matmul %63, %64, %cst_32 {dimension_numbers = #tpu.dot_dimension_numbers<[1], [0], [0], [1], [0, 0, 1, 1], [], []>} : vector<16x8xf32>, vector<8x32xf32>, vector<16x32xf32> -> vector<16x32xf32>
    %66 = arith.addf %43, %65 : vector<16x32xf32>
    %67 = vector.extract_strided_slice %7 {offsets = [0, 16], sizes = [16, 8], strides = [1, 1]} : vector<16x32xf32> to vector<16x8xf32>
    %68 = vector.shape_cast %67 : vector<16x8xf32> to vector<2x8x8xf32>
    %69 = vector.extract_strided_slice %12 {offsets = [0, 16], sizes = [16, 8], strides = [1, 1]} : vector<16x32xf32> to vector<16x8xf32>
    %70 = vector.shape_cast %69 : vector<16x8xf32> to vector<2x8x8xf32>
    %71 = vector.extract_strided_slice %17 {offsets = [0, 16], sizes = [16, 8], strides = [1, 1]} : vector<16x32xf32> to vector<16x8xf32>
    %72 = vector.shape_cast %71 : vector<16x8xf32> to vector<2x8x8xf32>
    "tpu.trace_start"() <{level = 10 : i32, message = "nld,nsd->nls"}> : () -> ()
    %cst_33 = arith.constant dense<0.000000e+00> : vector<2x8x8xf32>
    %73 = tpu.matmul %68, %70, %cst_33 {dimension_numbers = #tpu.dot_dimension_numbers<[2], [2], [1], [1], [0, 0, 0, 1, 1, 1], [0], [0]>} : vector<2x8x8xf32>, vector<2x8x8xf32>, vector<2x8x8xf32> -> vector<2x8x8xf32>
    "tpu.trace_stop"() : () -> ()
    %cst_34 = arith.constant dense<0xFF800000> : vector<2x8xf32>
    %74 = vector.multi_reduction <maximumf>, %73, %cst_34 [2] : vector<2x8x8xf32> to vector<2x8xf32>
    %75 = vector.shape_cast %74 : vector<2x8xf32> to vector<2x8x1xf32>
    %76 = vector.broadcast %75 : vector<2x8x1xf32> to vector<2x8x8xf32>
    %77 = arith.subf %73, %76 : vector<2x8x8xf32>
    %78 = math.exp %77 : vector<2x8x8xf32>
    %cst_35 = arith.constant dense<0.000000e+00> : vector<2x8xf32>
    %79 = vector.multi_reduction <add>, %78, %cst_35 [2] : vector<2x8x8xf32> to vector<2x8xf32>
    %80 = vector.shape_cast %79 : vector<2x8xf32> to vector<2x8x1xf32>
    %81 = tpu.reciprocal %80 : vector<2x8x1xf32> -> vector<2x8x1xf32>
    %82 = vector.broadcast %81 : vector<2x8x1xf32> to vector<2x8x8xf32>
    %83 = arith.mulf %78, %82 : vector<2x8x8xf32>
    %84 = arith.addf %61, %83 : vector<2x8x8xf32>
    "tpu.trace_start"() <{level = 10 : i32, message = "nls,nsd->nld"}> : () -> ()
    %cst_36 = arith.constant dense<0.000000e+00> : vector<2x8x8xf32>
    %85 = tpu.matmul %83, %72, %cst_36 {dimension_numbers = #tpu.dot_dimension_numbers<[2], [1], [1], [2], [0, 0, 0, 1, 1, 2], [0], [0]>} : vector<2x8x8xf32>, vector<2x8x8xf32>, vector<2x8x8xf32> -> vector<2x8x8xf32>
    "tpu.trace_stop"() : () -> ()
    %86 = vector.shape_cast %85 : vector<2x8x8xf32> to vector<16x8xf32>
    %87 = vector.extract_strided_slice %18 {offsets = [16, 0], sizes = [8, 32], strides = [1, 1]} : vector<32x32xf32> to vector<8x32xf32>
    %cst_37 = arith.constant dense<0.000000e+00> : vector<16x32xf32>
    %88 = tpu.matmul %86, %87, %cst_37 {dimension_numbers = #tpu.dot_dimension_numbers<[1], [0], [0], [1], [0, 0, 1, 1], [], []>} : vector<16x8xf32>, vector<8x32xf32>, vector<16x32xf32> -> vector<16x32xf32>
    %89 = arith.addf %66, %88 : vector<16x32xf32>
    %90 = vector.extract_strided_slice %7 {offsets = [0, 24], sizes = [16, 8], strides = [1, 1]} : vector<16x32xf32> to vector<16x8xf32>
    %91 = vector.shape_cast %90 : vector<16x8xf32> to vector<2x8x8xf32>
    %92 = vector.extract_strided_slice %12 {offsets = [0, 24], sizes = [16, 8], strides = [1, 1]} : vector<16x32xf32> to vector<16x8xf32>
    %93 = vector.shape_cast %92 : vector<16x8xf32> to vector<2x8x8xf32>
    %94 = vector.extract_strided_slice %17 {offsets = [0, 24], sizes = [16, 8], strides = [1, 1]} : vector<16x32xf32> to vector<16x8xf32>
    %95 = vector.shape_cast %94 : vector<16x8xf32> to vector<2x8x8xf32>
    "tpu.trace_start"() <{level = 10 : i32, message = "nld,nsd->nls"}> : () -> ()
    %cst_38 = arith.constant dense<0.000000e+00> : vector<2x8x8xf32>
    %96 = tpu.matmul %91, %93, %cst_38 {dimension_numbers = #tpu.dot_dimension_numbers<[2], [2], [1], [1], [0, 0, 0, 1, 1, 1], [0], [0]>} : vector<2x8x8xf32>, vector<2x8x8xf32>, vector<2x8x8xf32> -> vector<2x8x8xf32>
    "tpu.trace_stop"() : () -> ()
    %cst_39 = arith.constant dense<0xFF800000> : vector<2x8xf32>
    %97 = vector.multi_reduction <maximumf>, %96, %cst_39 [2] : vector<2x8x8xf32> to vector<2x8xf32>
    %98 = vector.shape_cast %97 : vector<2x8xf32> to vector<2x8x1xf32>
    %99 = vector.broadcast %98 : vector<2x8x1xf32> to vector<2x8x8xf32>
    %100 = arith.subf %96, %99 : vector<2x8x8xf32>
    %101 = math.exp %100 : vector<2x8x8xf32>
    %cst_40 = arith.constant dense<0.000000e+00> : vector<2x8xf32>
    %102 = vector.multi_reduction <add>, %101, %cst_40 [2] : vector<2x8x8xf32> to vector<2x8xf32>
    %103 = vector.shape_cast %102 : vector<2x8xf32> to vector<2x8x1xf32>
    %104 = tpu.reciprocal %103 : vector<2x8x1xf32> -> vector<2x8x1xf32>
    %105 = vector.broadcast %104 : vector<2x8x1xf32> to vector<2x8x8xf32>
    %106 = arith.mulf %101, %105 : vector<2x8x8xf32>
    %107 = arith.addf %84, %106 : vector<2x8x8xf32>
    "tpu.trace_start"() <{level = 10 : i32, message = "nls,nsd->nld"}> : () -> ()
    %cst_41 = arith.constant dense<0.000000e+00> : vector<2x8x8xf32>
    %108 = tpu.matmul %106, %95, %cst_41 {dimension_numbers = #tpu.dot_dimension_numbers<[2], [1], [1], [2], [0, 0, 0, 1, 1, 2], [0], [0]>} : vector<2x8x8xf32>, vector<2x8x8xf32>, vector<2x8x8xf32> -> vector<2x8x8xf32>
    "tpu.trace_stop"() : () -> ()
    %109 = vector.shape_cast %108 : vector<2x8x8xf32> to vector<16x8xf32>
    %110 = vector.extract_strided_slice %18 {offsets = [24, 0], sizes = [8, 32], strides = [1, 1]} : vector<32x32xf32> to vector<8x32xf32>
    %cst_42 = arith.constant dense<0.000000e+00> : vector<16x32xf32>
    %111 = tpu.matmul %109, %110, %cst_42 {dimension_numbers = #tpu.dot_dimension_numbers<[1], [0], [0], [1], [0, 0, 1, 1], [], []>} : vector<16x8xf32>, vector<8x32xf32>, vector<16x32xf32> -> vector<16x32xf32>
    %112 = arith.addf %89, %111 : vector<16x32xf32>
    %cst_43 = arith.constant 2.500000e-01 : f32
    %113 = vector.broadcast %cst_43 : f32 to vector<2x8x8xf32>
    %114 = arith.mulf %107, %113 : vector<2x8x8xf32>
    %c0_44 = arith.constant 0 : index
    %c0_45 = arith.constant 0 : index
    %c0_46 = arith.constant 0 : index
    %115 = vector.load %arg21[%c0_44, %c0_45, %c0_46] : memref<2x8x8xf32, #tpu.memory_space<vmem>>, vector<2x8x8xf32>
    tpu.vector_store %arg21[%c0_44, %c0_45, %c0_46], %114 {strides = array<i32>} : memref<2x8x8xf32, #tpu.memory_space<vmem>>, vector<2x8x8xf32>,
    %c0_47 = arith.constant 0 : index
    %c0_48 = arith.constant 0 : index
    %116 = vector.load %arg11[%c0_47, %c0_48] : memref<1x32xf32, #tpu.memory_space<vmem>>, vector<1x32xf32>
    %117 = vector.broadcast %116 : vector<1x32xf32> to vector<16x32xf32>
    %118 = arith.addf %112, %117 : vector<16x32xf32>
    %cst_49 = arith.constant dense<0.000000e+00> : vector<16xf32>
    %119 = vector.multi_reduction <add>, %118, %cst_49 [1] : vector<16x32xf32> to vector<16xf32>
    %120 = vector.shape_cast %119 : vector<16xf32> to vector<16x1xf32>
    %cst_50 = arith.constant 3.200000e+01 : f32
    %121 = vector.broadcast %cst_50 : f32 to vector<16x1xf32>
    %122 = arith.divf %120, %121 : vector<16x1xf32>
    %123 = vector.broadcast %122 : vector<16x1xf32> to vector<16x32xf32>
    %124 = arith.subf %118, %123 : vector<16x32xf32>
    %125 = arith.mulf %124, %124 : vector<16x32xf32>
    %cst_51 = arith.constant dense<0.000000e+00> : vector<16xf32>
    %126 = vector.multi_reduction <add>, %125, %cst_51 [1] : vector<16x32xf32> to vector<16xf32>
    %127 = vector.shape_cast %126 : vector<16xf32> to vector<16x1xf32>
    %cst_52 = arith.constant 3.200000e+01 : f32
    %128 = vector.broadcast %cst_52 : f32 to vector<16x1xf32>
    %129 = arith.divf %127, %128 : vector<16x1xf32>
    %cst_53 = arith.constant 9.99999974E-6 : f32
    %130 = vector.broadcast %cst_53 : f32 to vector<16x1xf32>
    %131 = arith.addf %129, %130 : vector<16x1xf32>
    %132 = math.rsqrt %131 : vector<16x1xf32>
    %133 = vector.broadcast %132 : vector<16x1xf32> to vector<16x32xf32>
    %134 = arith.mulf %124, %133 : vector<16x32xf32>
    %c0_54 = arith.constant 0 : index
    %c0_55 = arith.constant 0 : index
    %135 = vector.load %arg12[%c0_54, %c0_55] : memref<1x32xf32, #tpu.memory_space<vmem>>, vector<1x32xf32>
    %136 = vector.broadcast %135 : vector<1x32xf32> to vector<16x32xf32>
    %137 = arith.mulf %134, %136 : vector<16x32xf32>
    %c0_56 = arith.constant 0 : index
    %c0_57 = arith.constant 0 : index
    %138 = vector.load %arg13[%c0_56, %c0_57] : memref<1x32xf32, #tpu.memory_space<vmem>>, vector<1x32xf32>
    %139 = vector.broadcast %138 : vector<1x32xf32> to vector<16x32xf32>
    %140 = arith.addf %137, %139 : vector<16x32xf32>
    %c0_58 = arith.constant 0 : index
    %c0_59 = arith.constant 0 : index
    %141 = vector.load %arg16[%c0_58, %c0_59] : memref<32x64xf32, #tpu.memory_space<vmem>>, vector<32x64xf32>
    %cst_60 = arith.constant dense<0.000000e+00> : vector<16x64xf32>
    %142 = tpu.matmul %140, %141, %cst_60 {dimension_numbers = #tpu.dot_dimension_numbers<[1], [0], [0], [1], [0, 0, 1, 1], [], []>} : vector<16x32xf32>, vector<32x64xf32>, vector<16x64xf32> -> vector<16x64xf32>
    %c0_61 = arith.constant 0 : index
    %c0_62 = arith.constant 0 : index
    %143 = vector.load %arg17[%c0_61, %c0_62] : memref<1x64xf32, #tpu.memory_space<vmem>>, vector<1x64xf32>
    %144 = vector.broadcast %143 : vector<1x64xf32> to vector<16x64xf32>
    %145 = arith.addf %142, %144 : vector<16x64xf32>
    %cst_63 = arith.constant 0.000000e+00 : f32
    %146 = vector.broadcast %cst_63 : f32 to vector<16x64xf32>
    %147 = arith.maximumf %145, %146 : vector<16x64xf32>
    %c0_64 = arith.constant 0 : index
    %c0_65 = arith.constant 0 : index
    %148 = vector.load %arg18[%c0_64, %c0_65] : memref<64x32xf32, #tpu.memory_space<vmem>>, vector<64x32xf32>
    %cst_66 = arith.constant dense<0.000000e+00> : vector<16x32xf32>
    %149 = tpu.matmul %147, %148, %cst_66 {dimension_numbers = #tpu.dot_dimension_numbers<[1], [0], [0], [1], [0, 0, 1, 1], [], []>} : vector<16x64xf32>, vector<64x32xf32>, vector<16x32xf32> -> vector<16x32xf32>
    %c0_67 = arith.constant 0 : index
    %c0_68 = arith.constant 0 : index
    %150 = vector.load %arg19[%c0_67, %c0_68] : memref<1x32xf32, #tpu.memory_space<vmem>>, vector<1x32xf32>
    %151 = vector.broadcast %150 : vector<1x32xf32> to vector<16x32xf32>
    %152 = arith.addf %149, %151 : vector<16x32xf32>
    %153 = arith.addf %140, %152 : vector<16x32xf32>
    %cst_69 = arith.constant dense<0.000000e+00> : vector<16xf32>
    %154 = vector.multi_reduction <add>, %153, %cst_69 [1] : vector<16x32xf32> to vector<16xf32>
    %155 = vector.shape_cast %154 : vector<16xf32> to vector<16x1xf32>
    %cst_70 = arith.constant 3.200000e+01 : f32
    %156 = vector.broadcast %cst_70 : f32 to vector<16x1xf32>
    %157 = arith.divf %155, %156 : vector<16x1xf32>
    %158 = vector.broadcast %157 : vector<16x1xf32> to vector<16x32xf32>
    %159 = arith.subf %153, %158 : vector<16x32xf32>
    %160 = arith.mulf %159, %159 : vector<16x32xf32>
    %cst_71 = arith.constant dense<0.000000e+00> : vector<16xf32>
    %161 = vector.multi_reduction <add>, %160, %cst_71 [1] : vector<16x32xf32> to vector<16xf32>
    %162 = vector.shape_cast %161 : vector<16xf32> to vector<16x1xf32>
    %cst_72 = arith.constant 3.200000e+01 : f32
    %163 = vector.broadcast %cst_72 : f32 to vector<16x1xf32>
    %164 = arith.divf %162, %163 : vector<16x1xf32>
    %cst_73 = arith.constant 9.99999974E-6 : f32
    %165 = vector.broadcast %cst_73 : f32 to vector<16x1xf32>
    %166 = arith.addf %164, %165 : vector<16x1xf32>
    %167 = math.rsqrt %166 : vector<16x1xf32>
    %168 = vector.broadcast %167 : vector<16x1xf32> to vector<16x32xf32>
    %169 = arith.mulf %159, %168 : vector<16x32xf32>
    %c0_74 = arith.constant 0 : index
    %c0_75 = arith.constant 0 : index
    %170 = vector.load %arg14[%c0_74, %c0_75] : memref<1x32xf32, #tpu.memory_space<vmem>>, vector<1x32xf32>
    %171 = vector.broadcast %170 : vector<1x32xf32> to vector<16x32xf32>
    %172 = arith.mulf %169, %171 : vector<16x32xf32>
    %c0_76 = arith.constant 0 : index
    %c0_77 = arith.constant 0 : index
    %173 = vector.load %arg15[%c0_76, %c0_77] : memref<1x32xf32, #tpu.memory_space<vmem>>, vector<1x32xf32>
    %174 = vector.broadcast %173 : vector<1x32xf32> to vector<16x32xf32>
    %175 = arith.addf %172, %174 : vector<16x32xf32>
    %176 = vector.shape_cast %175 : vector<16x32xf32> to vector<2x8x32xf32>
    %c0_78 = arith.constant 0 : index
    %c0_79 = arith.constant 0 : index
    %c0_80 = arith.constant 0 : index
    %177 = vector.load %arg20[%c0_78, %c0_79, %c0_80] : memref<2x8x32xf32, #tpu.memory_space<vmem>>, vector<2x8x32xf32>
    tpu.vector_store %arg20[%c0_78, %c0_79, %c0_80], %176 {strides = array<i32>} : memref<2x8x32xf32, #tpu.memory_space<vmem>>, vector<2x8x32xf32>,
    return
  }
  func.func @transform_0(%arg0: i32) -> (i32, i32) {
    %c0_i32 = arith.constant 0 : i32
    %c0_i32_0 = arith.constant 0 : i32
    return %arg0, %c0_i32 : i32, i32
  }
  func.func @transform_1(%arg0: i32) -> (i32, i32) {
    %c0_i32 = arith.constant 0 : i32
    %c0_i32_0 = arith.constant 0 : i32
    return %arg0, %c0_i32 : i32, i32
  }
  func.func @transform_2(%arg0: i32) -> (i32, i32) {
    %c0_i32 = arith.constant 0 : i32
    %c0_i32_0 = arith.constant 0 : i32
    return %arg0, %c0_i32 : i32, i32
  }
  func.func @transform_3(%arg0: i32) -> (i32, i32) {
    %c0_i32 = arith.constant 0 : i32
    %c0_i32_0 = arith.constant 0 : i32
    %c0_i32_1 = arith.constant 0 : i32
    return %c0_i32, %c0_i32_0 : i32, i32
  }
  func.func @transform_4(%arg0: i32) -> (i32, i32) {
    %c0_i32 = arith.constant 0 : i32
    %c0_i32_0 = arith.constant 0 : i32
    %c0_i32_1 = arith.constant 0 : i32
    return %c0_i32, %c0_i32_0 : i32, i32
  }
  func.func @transform_5(%arg0: i32) -> (i32, i32) {
    %c0_i32 = arith.constant 0 : i32
    %c0_i32_0 = arith.constant 0 : i32
    %c0_i32_1 = arith.constant 0 : i32
    return %c0_i32, %c0_i32_0 : i32, i32
  }
  func.func @transform_6(%arg0: i32) -> (i32, i32) {
    %c0_i32 = arith.constant 0 : i32
    %c0_i32_0 = arith.constant 0 : i32
    %c0_i32_1 = arith.constant 0 : i32
    return %c0_i32, %c0_i32_0 : i32, i32
  }
  func.func @transform_7(%arg0: i32) -> (i32, i32) {
    %c0_i32 = arith.constant 0 : i32
    %c0_i32_0 = arith.constant 0 : i32
    %c0_i32_1 = arith.constant 0 : i32
    return %c0_i32, %c0_i32_0 : i32, i32
  }
  func.func @transform_8(%arg0: i32) -> (i32, i32) {
    %c0_i32 = arith.constant 0 : i32
    %c0_i32_0 = arith.constant 0 : i32
    %c0_i32_1 = arith.constant 0 : i32
    return %c0_i32, %c0_i32_0 : i32, i32
  }
  func.func @transform_9(%arg0: i32) -> (i32, i32) {
    %c0_i32 = arith.constant 0 : i32
    %c0_i32_0 = arith.constant 0 : i32
    %c0_i32_1 = arith.constant 0 : i32
    return %c0_i32, %c0_i32_0 : i32, i32
  }
  func.func @transform_10(%arg0: i32) -> (i32, i32) {
    %c0_i32 = arith.constant 0 : i32
    %c0_i32_0 = arith.constant 0 : i32
    %c0_i32_1 = arith.constant 0 : i32
    return %c0_i32, %c0_i32_0 : i32, i32
  }
  func.func @transform_11(%arg0: i32) -> (i32, i32) {
    %c0_i32 = arith.constant 0 : i32
    %c0_i32_0 = arith.constant 0 : i32
    %c0_i32_1 = arith.constant 0 : i32
    return %c0_i32, %c0_i32_0 : i32, i32
  }
  func.func @transform_12(%arg0: i32) -> (i32, i32) {
    %c0_i32 = arith.constant 0 : i32
    %c0_i32_0 = arith.constant 0 : i32
    %c0_i32_1 = arith.constant 0 : i32
    return %c0_i32, %c0_i32_0 : i32, i32
  }
  func.func @transform_13(%arg0: i32) -> (i32, i32) {
    %c0_i32 = arith.constant 0 : i32
    %c0_i32_0 = arith.constant 0 : i32
    %c0_i32_1 = arith.constant 0 : i32
    return %c0_i32, %c0_i32_0 : i32, i32
  }
  func.func @transform_14(%arg0: i32) -> (i32, i32) {
    %c0_i32 = arith.constant 0 : i32
    %c0_i32_0 = arith.constant 0 : i32
    %c0_i32_1 = arith.constant 0 : i32
    return %c0_i32, %c0_i32_0 : i32, i32
  }
  func.func @transform_15(%arg0: i32) -> (i32, i32) {
    %c0_i32 = arith.constant 0 : i32
    %c0_i32_0 = arith.constant 0 : i32
    %c0_i32_1 = arith.constant 0 : i32
    return %c0_i32, %c0_i32_0 : i32, i32
  }
  func.func @transform_16(%arg0: i32) -> (i32, i32) {
    %c0_i32 = arith.constant 0 : i32
    %c0_i32_0 = arith.constant 0 : i32
    %c0_i32_1 = arith.constant 0 : i32
    return %c0_i32, %c0_i32_0 : i32, i32
  }
  func.func @transform_17(%arg0: i32) -> (i32, i32) {
    %c0_i32 = arith.constant 0 : i32
    %c0_i32_0 = arith.constant 0 : i32
    %c0_i32_1 = arith.constant 0 : i32
    return %c0_i32, %c0_i32_0 : i32, i32
  }
  func.func @transform_18(%arg0: i32) -> (i32, i32) {
    %c0_i32 = arith.constant 0 : i32
    %c0_i32_0 = arith.constant 0 : i32
    %c0_i32_1 = arith.constant 0 : i32
    return %c0_i32, %c0_i32_0 : i32, i32
  }
  func.func @transform_19(%arg0: i32) -> (i32, i32, i32) {
    %c0_i32 = arith.constant 0 : i32
    %c0_i32_0 = arith.constant 0 : i32
    %c0_i32_1 = arith.constant 0 : i32
    return %arg0, %c0_i32, %c0_i32_0 : i32, i32, i32
  }
  func.func @transform_20(%arg0: i32) -> (i32, i32, i32) {
    %c0_i32 = arith.constant 0 : i32
    %c0_i32_0 = arith.constant 0 : i32
    %c0_i32_1 = arith.constant 0 : i32
    return %arg0, %c0_i32, %c0_i32_0 : i32, i32, i32
  }
}

</mosaic_0001>

<bundles_post_ra>
// kernel: tpu_custom_call.1
= control target key start
LH: loop header
LB: loop body
LE: loop exit
PB: predicated region body
PF: predicated region fallthrough
CT: control target
= control target key end

     0   :  { %s3863_s0 = inlined_call_operand.hbm [shape: f32[16,32], index: 0, kind: input, shape index: {}]   ;;  %s3864_s1 = inlined_call_operand.hbm [shape: f32[16,32], index: 1, kind: input, shape index: {}]   ;;  %s3865_s2 = inlined_call_operand.hbm [shape: f32[16,32], index: 2, kind: input, shape index: {}]   ;;  %s3866_s3 = inlined_call_operand.vmem [shape: f32[32,32], index: 3, kind: input, shape index: {}]   ;;  %s3867_s4 = inlined_call_operand.vmem [shape: f32[32,32], index: 4, kind: input, shape index: {}]   ;;  %s3868_s5 = inlined_call_operand.vmem [shape: f32[32,32], index: 5, kind: input, shape index: {}]   ;;  %s3869_s6 = inlined_call_operand.hbm [shape: f32[1,32], index: 6, kind: input, shape index: {}]   ;;  %s3870_s7 = inlined_call_operand.hbm [shape: f32[1,32], index: 7, kind: input, shape index: {}]   ;;  %s3871_s8 = inlined_call_operand.hbm [shape: f32[1,32], index: 8, kind: input, shape index: {}]   ;;  %s3872_s9 = inlined_call_operand.vmem [shape: f32[32,32], index: 9, kind: input, shape index: {}]   ;;  %s3873_s10 = inlined_call_operand.hbm [shape: f32[1,32], index: 10, kind: input, shape index: {}]   ;;  %s3874_s11 = inlined_call_operand.hbm [shape: f32[1,32], index: 11, kind: input, shape index: {}]   ;;  %s3875_s12 = inlined_call_operand.hbm [shape: f32[1,32], index: 12, kind: input, shape index: {}]   ;;  %s3876_s13 = inlined_call_operand.hbm [shape: f32[1,32], index: 13, kind: input, shape index: {}]   ;;  %s3877_s14 = inlined_call_operand.hbm [shape: f32[1,32], index: 14, kind: input, shape index: {}]   ;;  %s3878_s15 = inlined_call_operand.hbm [shape: f32[32,64], index: 15, kind: input, shape index: {}]   ;;  %s3879_s16 = inlined_call_operand.hbm [shape: f32[1,64], index: 16, kind: input, shape index: {}]   ;;  %s3880_s17 = inlined_call_operand.vmem [shape: f32[64,32], index: 17, kind: input, shape index: {}]   ;;  %s3881_s18 = inlined_call_operand.vmem [shape: f32[1,32], index: 18, kind: input, shape index: {}]   ;;  %s3882_s19 = inlined_call_operand.hbm [shape: f32[2,8,32], index: 19, kind: output, shape index: {0}]   ;;  %s3883_s20 = inlined_call_operand.hbm [shape: f32[2,8,8], index: 20, kind: output, shape index: {1}]  }
   0x1   :  { %3891 = sst [smem:[#allocation35_spill]] %s3863_s0 }
   0x2   :  { %3892 = sst [smem:[#allocation36_spill]] %s3864_s1 }
   0x3   :  { %3893 = sst [smem:[#allocation37_spill]] %s3865_s2 }
   0x4   :  { %3894 = sst [smem:[#allocation38_spill]] %s3866_s3 }
   0x5   :  { %3895 = sst [smem:[#allocation39_spill]] %s3867_s4 }
   0x6   :  { %26 = vsyncpa [#allocation3], 0 }
   0x7   :  { %27 = vsyncpa [#allocation6], 0 }
   0x8   :  { %28 = vsyncpa [#allocation9], 0 }
   0x9   :  { %29 = vsyncpa [#allocation12], 0 }
   0xa   :  { %30 = vsyncpa [#allocation15], 0 }
   0xb   :  { %31 = vsyncpa [#allocation18], 0 }
   0xc   :  { %32 = vsyncpa [#allocation21], 0 }
   0xd   :  { %33 = vsyncpa [#allocation4], 0 }
   0xe   :  { %34 = vsyncpa [#allocation25], 0  ;;  %s3253_s1 = smov [#allocation5]   ;;  %s3254_s23 = smov [#allocation8]  }
   0xf   :  { %s52_s22 = sshll.u32 %s3253_s1, 4  ;;  %s83_s24 = sshll.u32 %s3254_s23, 4  ;;  %s53_s22 = int_to_ptr.vmem [resolvable:$true] %s52_s22  ;;  %s3380_s24 = int_to_ptr.vmem [resolvable:$true] %s83_s24 }
  0x10   :  { %s3896_s3 = sld [smem:[#allocation36_spill]] }
  0x16   :  { %s2905_s26 = scalar_lea.hbm %s3896_s3, 256 }
  0x17   :  { %p2906_p0 = scmp.ne.s32.totalorder %s3896_s3, %s2905_s26  ;;  %p2909_p1 = scmp.lt.u32.totalorder %s2905_s26, %s3896_s3 }
  0x19   :  { %p2911_p2 = pnand %p2909_p1, %p2906_p0 }
  0x1b   :  { %2914 = shalt.err (!%p2911_p2)
}
  0x1c   :  { %s2915_s30 = scalar_lea.vmem %s53_s22, 256  ;;  %p2920_p4 = scmp.lt.s32.totalorder %s53_s22, %s53_s22 }
  0x1d   :  { %p2916_p3 = scmp.ne.s32.totalorder %s53_s22, %s2915_s30  ;;  %p2921_p5 = scmp.lt.s32.totalorder %s2915_s30, %s2915_s30 }
  0x1f   :  { %p2922_p6 = por %p2921_p5, %p2920_p4 }
  0x21   :  { %p2923_p7 = pnand %p2922_p6, %p2916_p3 }
  0x23   :  { %2926 = shalt.err (!%p2923_p7)
}
  0x24   :  { %s3889_s0 = smov 128   ;;  %s3256_s21 = smov 8  }
  0x25   :  { %58 = dma.hbm_to_vmem [thread:$0]  %s3896_s3, 256, %s53_s22, [#allocation6], %s3889_s0, %s3889_s0, %s3256_s21  }
  0x26   :  { %s2927_s26 = scalar_lea.hbm %s3869_s6, 16 }
  0x27   :  { %p2928_p8 = scmp.ne.s32.totalorder %s3869_s6, %s2927_s26  ;;  %p2931_p9 = scmp.lt.u32.totalorder %s2927_s26, %s3869_s6 }
  0x29   :  { %p2933_p10 = pnand %p2931_p9, %p2928_p8 }
  0x2b   :  { %2936 = shalt.err (!%p2933_p10)
}
  0x2c   :  { %s2937_s30 = scalar_lea.vmem %s3380_s24, 16  ;;  %s2941_s22 = scalar_lea.vmem %s3380_s24, 32 }
  0x2d   :  { %p2938_p11 = scmp.ne.s32.totalorder %s3380_s24, %s2937_s30  ;;  %p2942_p12 = scmp.lt.s32.totalorder %s3380_s24, %s3380_s24 }
  0x2e   :  { %p2943_p13 = scmp.lt.s32.totalorder %s2941_s22, %s2937_s30 }
  0x30   :  { %p2944_p0 = por %p2943_p13, %p2942_p12 }
  0x32   :  { %p2945_p1 = pnand %p2944_p0, %p2938_p11 }
  0x34   :  { %2948 = shalt.err (!%p2945_p1)
}
  0x35   :  { %86 = dma.hbm_to_vmem [thread:$0]  %s3869_s6, 16, %s3380_s24, [#allocation9]  }
  0x36   :  { %s3257_s23 = smov [#allocation11]   ;;  %s3258_s25 = smov [#allocation14]  }
  0x37   :  { %s103_s2 = sshll.u32 %s3257_s23, 4  ;;  %s125_s26 = sshll.u32 %s3258_s25, 4  ;;  %s104_s2 = int_to_ptr.vmem [resolvable:$true] %s103_s2  ;;  %s126_s26 = int_to_ptr.vmem [resolvable:$true] %s125_s26 }
  0x38   :  { %s2949_s4 = scalar_lea.hbm %s3871_s8, 16 }
  0x39   :  { %p2950_p2 = scmp.ne.s32.totalorder %s3871_s8, %s2949_s4  ;;  %p2953_p3 = scmp.lt.u32.totalorder %s2949_s4, %s3871_s8 }
  0x3b   :  { %p2955_p4 = pnand %p2953_p3, %p2950_p2 }
  0x3d   :  { %2958 = shalt.err (!%p2955_p4)
}
  0x3e   :  { %s2959_s6 = scalar_lea.vmem %s104_s2, 16  ;;  %s2963_s24 = scalar_lea.vmem %s104_s2, 32 }
  0x3f   :  { %p2960_p5 = scmp.ne.s32.totalorder %s104_s2, %s2959_s6  ;;  %p2964_p6 = scmp.lt.s32.totalorder %s104_s2, %s104_s2 }
  0x40   :  { %p2965_p7 = scmp.lt.s32.totalorder %s2963_s24, %s2959_s6 }
  0x42   :  { %p2966_p8 = por %p2965_p7, %p2964_p6 }
  0x44   :  { %p2967_p9 = pnand %p2966_p8, %p2960_p5 }
  0x46   :  { %2970 = shalt.err (!%p2967_p9)
}
  0x47   :  { %106 = dma.hbm_to_vmem [thread:$0]  %s3871_s8, 16, %s104_s2, [#allocation12]  }
  0x48   :  { %s2971_s27 = scalar_lea.hbm %s3874_s11, 16 }
  0x49   :  { %p2972_p10 = scmp.ne.s32.totalorder %s3874_s11, %s2971_s27  ;;  %p2975_p11 = scmp.lt.u32.totalorder %s2971_s27, %s3874_s11 }
  0x4b   :  { %p2977_p12 = pnand %p2975_p11, %p2972_p10 }
  0x4d   :  { %2980 = shalt.err (!%p2977_p12)
}
  0x4e   :  { %s2981_s30 = scalar_lea.vmem %s126_s26, 16  ;;  %s2985_s22 = scalar_lea.vmem %s126_s26, 32 }
  0x4f   :  { %p2982_p13 = scmp.ne.s32.totalorder %s126_s26, %s2981_s30  ;;  %p2986_p0 = scmp.lt.s32.totalorder %s126_s26, %s126_s26 }
  0x50   :  { %p2987_p1 = scmp.lt.s32.totalorder %s2985_s22, %s2981_s30 }
  0x52   :  { %p2988_p2 = por %p2987_p1, %p2986_p0 }
  0x54   :  { %p2989_p3 = pnand %p2988_p2, %p2982_p13 }
  0x56   :  { %2992 = shalt.err (!%p2989_p3)
}
  0x57   :  { %128 = dma.hbm_to_vmem [thread:$0]  %s3874_s11, 16, %s126_s26, [#allocation15]  }
  0x58   :  { %s3259_s6 = smov [#allocation17]   ;;  %s3260_s3 = smov [#allocation20]  }
  0x59   :  { %s145_s24 = sshll.u32 %s3259_s6, 4  ;;  %s164_s1 = sshll.u32 %s3260_s3, 4  ;;  %s146_s24 = int_to_ptr.vmem [resolvable:$true] %s145_s24  ;;  %s3439_s1 = int_to_ptr.vmem [resolvable:$true] %s164_s1 }
  0x5a   :  { %s2993_s27 = scalar_lea.hbm %s3876_s13, 16 }
  0x5b   :  { %p2994_p4 = scmp.ne.s32.totalorder %s3876_s13, %s2993_s27  ;;  %p2997_p5 = scmp.lt.u32.totalorder %s2993_s27, %s3876_s13 }
  0x5d   :  { %p2999_p6 = pnand %p2997_p5, %p2994_p4 }
  0x5f   :  { %3002 = shalt.err (!%p2999_p6)
}
  0x60   :  { %s3003_s11 = scalar_lea.vmem %s146_s24, 16  ;;  %s3007_s26 = scalar_lea.vmem %s146_s24, 32 }
  0x61   :  { %p3004_p7 = scmp.ne.s32.totalorder %s146_s24, %s3003_s11  ;;  %p3008_p8 = scmp.lt.s32.totalorder %s146_s24, %s146_s24 }
  0x62   :  { %p3009_p9 = scmp.lt.s32.totalorder %s3007_s26, %s3003_s11 }
  0x64   :  { %p3010_p10 = por %p3009_p9, %p3008_p8 }
  0x66   :  { %p3011_p11 = pnand %p3010_p10, %p3004_p7 }
  0x68   :  { %3014 = shalt.err (!%p3011_p11)
}
  0x69   :  { %148 = dma.hbm_to_vmem [thread:$0]  %s3876_s13, 16, %s146_s24, [#allocation18]  }
  0x6a   :  { %s3015_s6 = scalar_lea.hbm %s3878_s15, 512 }
  0x6b   :  { %p3016_p12 = scmp.ne.s32.totalorder %s3878_s15, %s3015_s6  ;;  %p3019_p13 = scmp.lt.u32.totalorder %s3015_s6, %s3878_s15 }
  0x6d   :  { %p3021_p0 = pnand %p3019_p13, %p3016_p12 }
  0x6f   :  { %3024 = shalt.err (!%p3021_p0)
}
  0x70   :  { %s3025_s0 = scalar_lea.vmem %s3439_s1, 512  ;;  %p3030_p2 = scmp.lt.s32.totalorder %s3439_s1, %s3439_s1 }
  0x71   :  { %p3026_p1 = scmp.ne.s32.totalorder %s3439_s1, %s3025_s0  ;;  %p3031_p3 = scmp.lt.s32.totalorder %s3025_s0, %s3025_s0 }
  0x73   :  { %p3032_p4 = por %p3031_p3, %p3030_p2 }
  0x75   :  { %p3033_p5 = pnand %p3032_p4, %p3026_p1 }
  0x77   :  { %3036 = shalt.err (!%p3033_p5)
}
  0x78   :  { %s3897_s13 = smov 128   ;;  %s3261_s4 = smov [#allocation2]  }
  0x79   :  { %170 = dma.hbm_to_vmem [thread:$0]  %s3878_s15, 512, %s3439_s1, [#allocation21], %s3897_s13, %s3897_s13, %s3256_s21  }
  0x7a   :  { %s40_s29 = sshll.u32 %s3261_s4, 4  ;;  %s3262_s11 = smov [#allocation7]   ;;  %s41_s29 = int_to_ptr.vmem [resolvable:$true] %s40_s29 }
  0x7b   :  { %s64_s26 = sshll.u32 %s3262_s11, 4  ;;  %s3898_s8 = sld [smem:[#allocation35_spill]]  ;;  %s3473_s26 = int_to_ptr.vmem [resolvable:$true] %s64_s26 }
  0x81   :  { %s3037_s2 = scalar_lea.hbm %s3898_s8, 256 }
  0x82   :  { %p3038_p6 = scmp.ne.s32.totalorder %s3898_s8, %s3037_s2  ;;  %p3041_p7 = scmp.lt.u32.totalorder %s3037_s2, %s3898_s8 }
  0x84   :  { %p3043_p8 = pnand %p3041_p7, %p3038_p6 }
  0x86   :  { %3046 = shalt.err (!%p3043_p8)
}
  0x87   :  { %s3047_s15 = scalar_lea.vmem %s41_s29, 256  ;;  %p3052_p10 = scmp.lt.s32.totalorder %s41_s29, %s41_s29 }
  0x88   :  { %p3048_p9 = scmp.ne.s32.totalorder %s41_s29, %s3047_s15  ;;  %p3053_p11 = scmp.lt.s32.totalorder %s3047_s15, %s3047_s15 }
  0x8a   :  { %p3054_p12 = por %p3053_p11, %p3052_p10 }
  0x8c   :  { %p3055_p13 = pnand %p3054_p12, %p3048_p9 }
  0x8e   :  { %3058 = shalt.err (!%p3055_p13)
}
  0x8f   :  { %46 = dma.hbm_to_vmem [thread:$0]  %s3898_s8, 256, %s41_s29, [#allocation3], %s3897_s13, %s3897_s13, %s3256_s21  }
  0x90   :  { %s3899_s28 = sld [smem:[#allocation37_spill]] }
  0x96   :  { %s3059_s4 = scalar_lea.hbm %s3899_s28, 256 }
  0x97   :  { %p3060_p0 = scmp.ne.s32.totalorder %s3899_s28, %s3059_s4  ;;  %p3063_p1 = scmp.lt.u32.totalorder %s3059_s4, %s3899_s28 }
  0x99   :  { %p3065_p2 = pnand %p3063_p1, %p3060_p0 }
  0x9b   :  { %3068 = shalt.err (!%p3065_p2)
}
  0x9c   :  { %s3069_s6 = scalar_lea.vmem %s3473_s26, 256  ;;  %p3074_p4 = scmp.lt.s32.totalorder %s3473_s26, %s3473_s26 }
  0x9d   :  { %p3070_p3 = scmp.ne.s32.totalorder %s3473_s26, %s3069_s6  ;;  %p3075_p5 = scmp.lt.s32.totalorder %s3069_s6, %s3069_s6 }
  0x9f   :  { %p3076_p6 = por %p3075_p5, %p3074_p4 }
  0xa1   :  { %p3077_p7 = pnand %p3076_p6, %p3070_p3 }
  0xa3   :  { %3080 = shalt.err (!%p3077_p7)
}
  0xa4   :  { %70 = dma.hbm_to_vmem [thread:$0]  %s3899_s28, 256, %s3473_s26, [#allocation6], %s3897_s13, %s3897_s13, %s3256_s21  }
  0xa5   :  { %s3263_s3 = smov [#allocation10]   ;;  %s3264_s25 = smov [#allocation13]  }
  0xa6   :  { %s93_s23 = sshll.u32 %s3263_s3, 4  ;;  %s115_s15 = sshll.u32 %s3264_s25, 4  ;;  %s94_s23 = int_to_ptr.vmem [resolvable:$true] %s93_s23  ;;  %s116_s15 = int_to_ptr.vmem [resolvable:$true] %s115_s15 }
  0xa7   :  { %s3081_s0 = scalar_lea.hbm %s3870_s7, 16 }
  0xa8   :  { %p3082_p8 = scmp.ne.s32.totalorder %s3870_s7, %s3081_s0  ;;  %p3085_p9 = scmp.lt.u32.totalorder %s3081_s0, %s3870_s7 }
  0xaa   :  { %p3087_p10 = pnand %p3085_p9, %p3082_p8 }
  0xac   :  { %3090 = shalt.err (!%p3087_p10)
}
  0xad   :  { %s3091_s26 = scalar_lea.vmem %s94_s23, 16  ;;  %s3095_s28 = scalar_lea.vmem %s94_s23, 32 }
  0xae   :  { %p3092_p11 = scmp.ne.s32.totalorder %s94_s23, %s3091_s26  ;;  %p3096_p12 = scmp.lt.s32.totalorder %s94_s23, %s94_s23 }
  0xaf   :  { %p3097_p13 = scmp.lt.s32.totalorder %s3095_s28, %s3091_s26 }
  0xb1   :  { %p3098_p0 = por %p3097_p13, %p3096_p12 }
  0xb3   :  { %p3099_p1 = pnand %p3098_p0, %p3092_p11 }
  0xb5   :  { %3102 = shalt.err (!%p3099_p1)
}
  0xb6   :  { %96 = dma.hbm_to_vmem [thread:$0]  %s3870_s7, 16, %s94_s23, [#allocation9]  }
  0xb7   :  { %s3103_s8 = scalar_lea.hbm %s3873_s10, 16 }
  0xb8   :  { %p3104_p2 = scmp.ne.s32.totalorder %s3873_s10, %s3103_s8  ;;  %p3107_p3 = scmp.lt.u32.totalorder %s3103_s8, %s3873_s10 }
  0xba   :  { %p3109_p4 = pnand %p3107_p3, %p3104_p2 }
  0xbc   :  { %3112 = shalt.err (!%p3109_p4)
}
  0xbd   :  { %s3113_s0 = scalar_lea.vmem %s116_s15, 16  ;;  %s3117_s24 = scalar_lea.vmem %s116_s15, 32 }
  0xbe   :  { %p3114_p5 = scmp.ne.s32.totalorder %s116_s15, %s3113_s0  ;;  %p3118_p6 = scmp.lt.s32.totalorder %s116_s15, %s116_s15 }
  0xbf   :  { %p3119_p7 = scmp.lt.s32.totalorder %s3117_s24, %s3113_s0 }
  0xc1   :  { %p3120_p8 = por %p3119_p7, %p3118_p6 }
  0xc3   :  { %p3121_p9 = pnand %p3120_p8, %p3114_p5 }
  0xc5   :  { %3124 = shalt.err (!%p3121_p9)
}
  0xc6   :  { %118 = dma.hbm_to_vmem [thread:$0]  %s3873_s10, 16, %s116_s15, [#allocation12]  }
  0xc7   :  { %s3265_s4 = smov [#allocation16]   ;;  %s3266_s30 = smov [#allocation19]  }
  0xc8   :  { %s135_s11 = sshll.u32 %s3265_s4, 4  ;;  %s155_s26 = sshll.u32 %s3266_s30, 4  ;;  %s136_s11 = int_to_ptr.vmem [resolvable:$true] %s135_s11  ;;  %s156_s26 = int_to_ptr.vmem [resolvable:$true] %s155_s26 }
  0xc9   :  { %s3125_s2 = scalar_lea.hbm %s3875_s12, 16 }
  0xca   :  { %p3126_p10 = scmp.ne.s32.totalorder %s3875_s12, %s3125_s2  ;;  %p3129_p11 = scmp.lt.u32.totalorder %s3125_s2, %s3875_s12 }
  0xcc   :  { %p3131_p12 = pnand %p3129_p11, %p3126_p10 }
  0xce   :  { %3134 = shalt.err (!%p3131_p12)
}
  0xcf   :  { %s3135_s10 = scalar_lea.vmem %s136_s11, 16  ;;  %s3139_s15 = scalar_lea.vmem %s136_s11, 32 }
  0xd0   :  { %p3136_p13 = scmp.ne.s32.totalorder %s136_s11, %s3135_s10  ;;  %p3140_p0 = scmp.lt.s32.totalorder %s136_s11, %s136_s11 }
  0xd1   :  { %p3141_p1 = scmp.lt.s32.totalorder %s3139_s15, %s3135_s10 }
  0xd3   :  { %p3142_p2 = por %p3141_p1, %p3140_p0 }
  0xd5   :  { %p3143_p3 = pnand %p3142_p2, %p3136_p13 }
  0xd7   :  { %3146 = shalt.err (!%p3143_p3)
}
  0xd8   :  { %138 = dma.hbm_to_vmem [thread:$0]  %s3875_s12, 16, %s136_s11, [#allocation15]  }
  0xd9   :  { %s3147_s24 = scalar_lea.hbm %s3877_s14, 16 }
  0xda   :  { %p3148_p4 = scmp.ne.s32.totalorder %s3877_s14, %s3147_s24  ;;  %p3151_p5 = scmp.lt.u32.totalorder %s3147_s24, %s3877_s14 }
  0xdc   :  { %p3153_p6 = pnand %p3151_p5, %p3148_p4 }
  0xde   :  { %3156 = shalt.err (!%p3153_p6)
}
  0xdf   :  { %s3157_s28 = scalar_lea.vmem %s156_s26, 16  ;;  %s3161_s22 = scalar_lea.vmem %s156_s26, 32 }
  0xe0   :  { %p3158_p7 = scmp.ne.s32.totalorder %s156_s26, %s3157_s28  ;;  %p3162_p8 = scmp.lt.s32.totalorder %s156_s26, %s156_s26 }
  0xe1   :  { %p3163_p9 = scmp.lt.s32.totalorder %s3161_s22, %s3157_s28 }
  0xe3   :  { %p3164_p10 = por %p3163_p9, %p3162_p8 }
  0xe5   :  { %p3165_p11 = pnand %p3164_p10, %p3158_p7 }
  0xe7   :  { %3168 = shalt.err (!%p3165_p11)
}
  0xe8   :  { %158 = dma.hbm_to_vmem [thread:$0]  %s3877_s14, 16, %s156_s26, [#allocation18]  }
  0xe9   :  { %s3267_s2 = smov [#allocation22]   ;;  %s3169_s3 = scalar_lea.hbm %s3879_s16, 16 }
  0xea   :  { %s177_s6 = sshll.u32 %s3267_s2, 4  ;;  %p3170_p12 = scmp.ne.s32.totalorder %s3879_s16, %s3169_s3  ;;  %s178_s6 = int_to_ptr.vmem [resolvable:$true] %s177_s6 }
  0xeb   :  { %p3173_p13 = scmp.lt.u32.totalorder %s3169_s3, %s3879_s16 }
  0xed   :  { %p3175_p0 = pnand %p3173_p13, %p3170_p12 }
  0xef   :  { %3178 = shalt.err (!%p3175_p0)
}
  0xf0   :  { %s3179_s27 = scalar_lea.vmem %s178_s6, 16  ;;  %s3183_s14 = scalar_lea.vmem %s178_s6, 32 }
  0xf1   :  { %p3180_p1 = scmp.ne.s32.totalorder %s178_s6, %s3179_s27  ;;  %p3184_p2 = scmp.lt.s32.totalorder %s178_s6, %s178_s6 }
  0xf2   :  { %p3185_p3 = scmp.lt.s32.totalorder %s3183_s14, %s3179_s27 }
  0xf4   :  { %p3186_p4 = por %p3185_p3, %p3184_p2 }
  0xf6   :  { %p3187_p5 = pnand %p3186_p4, %p3180_p1 }
  0xf8   :  { %3190 = shalt.err (!%p3187_p5)
}
  0xf9   :  { %180 = dma.hbm_to_vmem [thread:$0]  %s3879_s16, 16, %s178_s6, [#allocation21]  }
  0xfa   :  { %3235 = dma.done.wait [#allocation3], 256  }
  0xfb   :  { %3236 = vsyncadd [#allocation3], 4294967040 }
  0xfc   :  { %3237 = dma.done.wait [#allocation6], 512  }
  0xfd   :  { %3238 = vsyncadd [#allocation6], 4294966784 }
  0xfe   :  { %3239 = dma.done.wait [#allocation9], 32  }
  0xff   :  { %3240 = vsyncadd [#allocation9], 4294967264 }
 0x100   :  { %3241 = dma.done.wait [#allocation12], 32  }
 0x101   :  { %3242 = vsyncadd [#allocation12], 4294967264 }
 0x102   :  { %3243 = dma.done.wait [#allocation15], 32  }
 0x103   :  { %3244 = vsyncadd [#allocation15], 4294967264 }
 0x104   :  { %3245 = dma.done.wait [#allocation18], 32  }
 0x105   :  { %3246 = vsyncadd [#allocation18], 4294967264 }
 0x106   :  { %3247 = dma.done.wait [#allocation21], 528  }
 0x107   :  { %3248 = vsyncadd [#allocation21], 4294966768  ;;  %vm241_vm0 = vcmask 261120   ;;  %s3900_s23 = sld [smem:[#allocation38_spill]]  ;;  %v224_v5 = vld [vmem:[#allocation2] sm:$0xff]  ;;  %s3901_s6 = sld [smem:[#allocation39_spill]] }
 0x108   :  { %2634 = vmatprep.mubr.msk.f32.mxu1 %vm241_vm0, %v224_v5  ;;  %v225_v12 = vld [vmem:[#allocation2 + $0x8] sm:$0xff]  ;;  %v226_v14 = vld [vmem:[#allocation5] sm:$0xff]  ;;  %v227_v15 = vld [vmem:[#allocation5 + $0x8] sm:$0xff]  ;;  %v3268_v16 = vmov 0.0   ;;  %vm3269_vm1 = vmmov 0   ;;  %vm511_vm2 = vcmask 64512  }
 0x109   :  { %v2499_v19 = vld [vmem:[#allocation10] ss:$0 sm:$0xff]  ;;  %v2496_v23 = vld [vmem:[#allocation8] ss:$0 sm:$0xff]  ;;  %s3270_s1 = smov 120   ;;  %v415_v27 = vld [vmem:[%s3868_s5] sm:$0xff] }
 0x10a   :  { %v416_v28 = vld [vmem:[%s3868_s5 + $0x8] sm:$0xff]  ;;  %v417_v29 = vld [vmem:[%s3868_s5 + $0x10] sm:$0xff]  ;;  %v418_v31 = vld [vmem:[%s3868_s5 + $0x18] sm:$0xff]  ;;  %s3271_s5 = smov 112   ;;  %s3272_s12 = smov 104   ;;  %vm2327_vm3 = vcmask 523264  }
 0x10b   :  { %v2805_v30 = vpack.c.bf16 %v416_v28, %v415_v27  ;;  %v228_v32 = vld [vmem:[#allocation7] sm:$0xff]  ;;  %v2809_v33 = vpack.c.bf16 %v418_v31, %v417_v29  ;;  %v229_v34 = vld [vmem:[#allocation7 + $0x8] sm:$0xff]  ;;  %v2502_v47 = vld [vmem:[#allocation11] ss:$0 sm:$0xff] }
 0x10c   :  { %2656 = vmatprep.mubr.msk.f32.mxu0 %vm241_vm0, %v228_v32 }
 0x10d   :  { %v230_v0 = vld [vmem:[%s3900_s23] sm:$0xff]  ;;  %v231_v1 = vld [vmem:[%s3900_s23 + $0x8] sm:$0xff]  ;;  %v232_v2 = vld [vmem:[%s3900_s23 + $0x10] sm:$0xff]  ;;  %2806 = vmatprep.subr.bf16.mxu0 %v2805_v30 }
 0x10e   :  { %v2789_v3 = vpack.c.bf16 %v231_v1, %v230_v0  ;;  %v233_v4 = vld [vmem:[%s3900_s23 + $0x18] sm:$0xff]  ;;  %v323_v7 = vld [vmem:[%s3901_s6] sm:$0xff]  ;;  %v324_v8 = vld [vmem:[%s3901_s6 + $0x8] sm:$0xff]  ;;  %2808 = vmatpush3.bf16.msra.mxu0 %v2805_v30 }
 0x10f   :  { %v2793_v6 = vpack.c.bf16 %v233_v4, %v232_v2  ;;  %v2797_v9 = vpack.c.bf16 %v324_v8, %v323_v7  ;;  %v325_v10 = vld [vmem:[%s3901_s6 + $0x10] sm:$0xff]  ;;  %v326_v11 = vld [vmem:[%s3901_s6 + $0x18] sm:$0xff]  ;;  %2810 = vmatprep.subr.bf16.mxu0 %v2809_v33 }
 0x110   :  { %2790 = vmatprep.subr.bf16.mxu1 %v2789_v3  ;;  %v2801_v13 = vpack.c.bf16 %v326_v11, %v325_v10 }
 0x111   :  { %2792 = vmatpush3.bf16.msra.mxu1 %v2789_v3 }
 0x112   :  { %2794 = vmatprep.subr.bf16.mxu1 %v2793_v6  ;;  %2812 = vmatpush3.bf16.msra.mxu0 %v2809_v33 }
 0x113   :  { %2669 = vmatprep.subr.mxu0 %v3268_v16 }
 0x115   :  { %2796 = vmatpush3.bf16.msra.mxu1 %v2793_v6  ;;  %2657 = vmatmul.mubr.msk.f32.vlgmr.msra.gmra.mrb[0].mxu0 %vm241_vm0, %v229_v34 }
 0x116   :  { %2798 = vmatprep.subr.bf16.mxu1 %v2797_v9  ;;  %2671 = vmatprep.mubr.msk.f32.mxu0 %vm3269_vm1, %v3268_v16 }
 0x118   :  { %2635 = vmatmul.mubr.msk.f32.vlgmr.msra.gmra.mrb[0].mxu1 %vm241_vm0, %v225_v12 }
 0x119   :  { %2800 = vmatpush3.bf16.msra.mxu1 %v2797_v9  ;;  %2645 = vmatprep.mubr.msk.f32.mxu1 %vm241_vm0, %v226_v14 }
 0x11a   :  { %2802 = vmatprep.subr.bf16.mxu1 %v2801_v13 }
 0x11d   :  { %2804 = vmatpush3.bf16.msra.mxu1 %v2801_v13 }
 0x11e   :  { %2659 = vmatprep.subr.mxu1 %v3268_v16 }
 0x120   :  { %2646 = vmatmul.mubr.msk.f32.vlgmr.msra.gmra.mrb[2].mxu1 %vm241_vm0, %v227_v15 }
 0x121   :  { %2661 = vmatprep.mubr.msk.f32.mxu1 %vm3269_vm1, %v3268_v16 }
 0x1e8   :  { %v2658_v46 = vpop.f32.mrb[0].mxu0 }
 0x1e9   :  { %v3647_v48 = vadd.f32 %v2658_v46, %v2502_v47  ;;  %v498_v49 = vpop.f32.mrb[1].mxu0 }
 0x1ea   :  { %v3649_v50 = vadd.f32 %v2502_v47, %v498_v49  ;;  %v508_v47 = vld [vmem:[%s3872_s9 + $0x8] sm:$0xff]  ;;  %v507_v49 = vld [vmem:[%s3872_s9] sm:$0xff] }
 0x1eb   :  { %v2636_v17 = vpop.f32.mrb[0].mxu1 }
 0x1ec   :  { %v314_v18 = vpop.f32.mrb[1].mxu1  ;;  %v3609_v25 = vadd.f32 %v2636_v17, %v2496_v23  ;;  %2670 = vmatpush3.msra.mxu0 %v3649_v50 }
 0x1ed   :  { %v3611_v26 = vadd.f32 %v2496_v23, %v314_v18  ;;  %2679 = vmatprep.subr.mxu0 %v3268_v16 }
 0x1f3   :  { %v2647_v20 = vpop.f32.mrb[2].mxu1 }
 0x1f4   :  { %v3601_v21 = vadd.f32 %v2647_v20, %v2499_v19  ;;  %v406_v22 = vpop.f32.mrb[3].mxu1 }
 0x1f5   :  { %v3603_v24 = vadd.f32 %v2499_v19, %v406_v22 }
 0x1f6   :  { %914 = vrot.lane.b32.xlu1 %v3601_v21, %s3270_s1 }
 0x1f7   :  { %2660 = vmatpush3.xpose.msk.msra.mxu1 %vm511_vm2, %v3603_v24 }
 0x1f8   :  { %2664 = vmatprep.subr.mxu1 %v3268_v16 }
 0x1fa   :  { %912 = vrot.lane.b32.xlu1 %v3609_v25, %s3270_s1  ;;  %2662 = vmatmul.mubr.msk.f32.vlgmr.msra.gmra.mrb[4].mxu1 %vm511_vm2, %v3611_v26 }
 0x1fb   :  { %2665 = vmatpush3.xpose.msk.msra.mxu1 %vm511_vm2, %v3601_v21  ;;  %2666 = vmatprep.mubr.msk.f32.mxu1 %vm3269_vm1, %v3268_v16 }
 0x1fc   :  { %2674 = vmatprep.subr.mxu1 %v3268_v16 }
 0x1fe   :  { %2667 = vmatmul.mubr.msk.f32.vlgmr.msra.gmra.mrb[6].mxu1 %vm511_vm2, %v3609_v25 }
 0x1ff   :  { %2676 = vmatprep.mubr.msk.f32.mxu1 %vm3269_vm1, %v3268_v16  ;;  %2675 = vmatpush3.msra.mxu1 %v3647_v48 }
 0x200   :  { %2684 = vmatprep.subr.mxu1 %v3268_v16 }
 0x268   :  { %v915_v56 = vpop.permute.xlu1 %914 }
 0x26c   :  { %v913_v58 = vpop.permute.xlu1 %912 }
 0x2cd   :  { %v584_v35 = vpop.f32.mrb[4].mxu1 }
 0x2ce   :  { %v2663_v36 = vpop.f32.mrb[5].mxu1  ;;  %v664_v45 = vsel %vm511_vm2, %v584_v35, -inf }
 0x2d1   :  { %v660_v37 = vpop.f32.mrb[6].mxu1 }
 0x2d2   :  { %v2668_v38 = vpop.f32.mrb[7].mxu1  ;;  %v667_v39 = vsel %vm511_vm2, %v660_v37, -inf }
 0x2d3   :  { %668 = vmax.xlane.f32.xlu0 %v667_v39 }
 0x360   :  { %v669_v40 = vpop.xlane.xlu0 %668 }
 0x361   :  { %v671_v41 = vsub.f32 %v660_v37, %v669_v40 }
 0x363   :  { %v674_v42 = vmul.f32 1.442695, %v671_v41 }
 0x365   :  { %2865 = vpow2.f32 %v674_v42 }
 0x36f   :  { %v2866_v43 = vpop.eup %2865 }
 0x370   :  { %v679_v44 = vsel %vm511_vm2, %v2866_v43, 0.0 }
 0x371   :  { %680 = vadd.xlane.f32.xlu0 %v679_v44 }
 0x375   :  { %665 = vmax.xlane.f32.xlu0 %v664_v45 }
 0x38b   :  { %836 = vrot.lane.b32.xlu0 %v3603_v24, %s3270_s1 }
 0x38f   :  { %834 = vrot.lane.b32.xlu0 %v3611_v26, %s3270_s1 }
 0x3fe   :  { %v681_v51 = vpop.xlane.xlu0 %680 }
 0x3ff   :  { %2867 = vrcp.f32 %v681_v51 }
 0x402   :  { %v666_v52 = vpop.xlane.xlu0 %665 }
 0x403   :  { %v670_v53 = vsub.f32 %v584_v35, %v666_v52 }
 0x405   :  { %v672_v54 = vmul.f32 1.442695, %v670_v53 }
 0x406   :  { %v837_v0 = vpop.permute.xlu0 %836 }
 0x407   :  { %2869 = vpow2.f32 %v672_v54 }
 0x409   :  { %v2868_v55 = vpop.eup %2867 }
 0x40a   :  { %v3659_v57 = vmul.f32 %v2868_v55, %v2866_v43  ;;  %v835_v2 = vpop.permute.xlu0 %834 }
 0x40c   :  { %2677 = vmatmul.mubr.msk.f32.vlgmr.msra.gmra.mrb[8].mxu1 %vm511_vm2, %v3659_v57 }
 0x40d   :  { %2685 = vmatpush3.xpose.msk.msra.mxu1 %vm511_vm2, %v915_v56  ;;  %2686 = vmatprep.mubr.msk.f32.mxu1 %vm3269_vm1, %v3268_v16 }
 0x40e   :  { %2694 = vmatprep.subr.mxu1 %v3268_v16 }
 0x410   :  { %2687 = vmatmul.mubr.msk.f32.vlgmr.msra.gmra.mrb[10].mxu1 %vm511_vm2, %v913_v58 }
 0x411   :  { %v2870_v59 = vpop.eup %2869  ;;  %2696 = vmatprep.mubr.msk.f32.mxu1 %vm3269_vm1, %v3268_v16 }
 0x412   :  { %v676_v60 = vsel %vm511_vm2, %v2870_v59, 0.0 }
 0x413   :  { %677 = vadd.xlane.f32.xlu1 %v676_v60 }
 0x424   :  { %1092 = vrot.lane.b32.xlu1 %v3647_v48, %s3270_s1 }
 0x428   :  { %1332 = vrot.lane.b32.xlu1 %v3603_v24, %s3271_s5 }
 0x42c   :  { %1410 = vrot.lane.b32.xlu1 %v3601_v21, %s3271_s5 }
 0x4a0   :  { %v678_v61 = vpop.xlane.xlu1 %677 }
 0x4a1   :  { %2871 = vrcp.f32 %v678_v61 }
 0x4a4   :  { %v1093_v62 = vpop.permute.xlu1 %1092 }
 0x4a5   :  { %2695 = vmatpush3.msra.mxu1 %v1093_v62 }
 0x4a6   :  { %2709 = vmatprep.subr.mxu1 %v3268_v16 }
 0x4a8   :  { %v1333_v19 = vpop.permute.xlu1 %1332 }
 0x4ab   :  { %v2872_v63 = vpop.eup %2871 }
 0x4ac   :  { %v3678_v1 = vmul.f32 %v2872_v63, %v2870_v59  ;;  %v1411_v20 = vpop.permute.xlu1 %1410 }
 0x4ae   :  { %2672 = vmatmul.mubr.msk.f32.vlgmr.msra.gmra.mrb[2].mxu0 %vm511_vm2, %v3678_v1 }
 0x4af   :  { %2680 = vmatpush3.xpose.msk.msra.mxu0 %vm511_vm2, %v837_v0  ;;  %2681 = vmatprep.mubr.msk.f32.mxu0 %vm3269_vm1, %v3268_v16 }
 0x4b0   :  { %2689 = vmatprep.subr.mxu0 %v3268_v16 }
 0x4b2   :  { %2682 = vmatmul.mubr.msk.f32.vlgmr.msra.gmra.mrb[4].mxu0 %vm511_vm2, %v835_v2 }
 0x4b3   :  { %2691 = vmatprep.mubr.msk.f32.mxu0 %vm3269_vm1, %v3268_v16 }
 0x4df   :  { %v3689_v3 = vpop.f32.mrb[8].mxu1 }
 0x4e0   :  { %v2678_v4 = vpop.f32.mrb[9].mxu1 }
 0x4e3   :  { %v986_v5 = vpop.f32.mrb[10].mxu1 }
 0x4e4   :  { %v2688_v6 = vpop.f32.mrb[11].mxu1  ;;  %v993_v7 = vsel %vm511_vm2, %v986_v5, -inf }
 0x4e5   :  { %994 = vmax.xlane.f32.xlu0 %v993_v7 }
 0x4fb   :  { %1330 = vrot.lane.b32.xlu0 %v3611_v26, %s3271_s5 }
 0x572   :  { %v995_v8 = vpop.xlane.xlu0 %994 }
 0x573   :  { %v997_v9 = vsub.f32 %v986_v5, %v995_v8 }
 0x575   :  { %v1000_v10 = vmul.f32 1.442695, %v997_v9 }
 0x576   :  { %v1331_v28 = vpop.permute.xlu0 %1330 }
 0x577   :  { %2873 = vpow2.f32 %v1000_v10 }
 0x581   :  { %v2874_v11 = vpop.eup %2873  ;;  %v3694_v12 = vpop.f32.mrb[2].mxu0 }
 0x582   :  { %v2673_v13 = vpop.f32.mrb[3].mxu0  ;;  %v1005_v14 = vsel %vm511_vm2, %v2874_v11, 0.0 }
 0x583   :  { %1006 = vadd.xlane.f32.xlu1 %v1005_v14 }
 0x585   :  { %v908_v15 = vpop.f32.mrb[4].mxu0 }
 0x586   :  { %v2683_v17 = vpop.f32.mrb[5].mxu0  ;;  %v990_v18 = vsel %vm511_vm2, %v908_v15, -inf }
 0x594   :  { %1408 = vrot.lane.b32.xlu1 %v3609_v25, %s3271_s5 }
 0x5b8   :  { %991 = vmax.xlane.f32.xlu1 %v990_v18 }
 0x5c9   :  { %1015 = vrot.lane.b32.xlu1 %v3649_v50, %s3270_s1 }
 0x610   :  { %v1007_v22 = vpop.xlane.xlu1 %1006 }
 0x611   :  { %2875 = vrcp.f32 %v1007_v22 }
 0x614   :  { %v1409_v29 = vpop.permute.xlu1 %1408 }
 0x61b   :  { %v2876_v23 = vpop.eup %2875 }
 0x61c   :  { %v3702_v27 = vmul.f32 %v2876_v23, %v2874_v11 }
 0x61e   :  { %2697 = vmatmul.mubr.msk.f32.vlgmr.msra.gmra.mrb[12].mxu1 %vm511_vm2, %v3702_v27  ;;  %v1013_v8 = vadd.f32 %v3702_v27, %v3659_v57 }
 0x61f   :  { %2710 = vmatpush3.xpose.msk.msra.mxu1 %vm511_vm2, %v1333_v19  ;;  %2711 = vmatprep.mubr.msk.f32.mxu1 %vm3269_vm1, %v3268_v16 }
 0x620   :  { %2714 = vmatprep.subr.mxu1 %v3268_v16 }
 0x622   :  { %2712 = vmatmul.mubr.msk.f32.vlgmr.msra.gmra.mrb[14].mxu1 %vm511_vm2, %v1331_v28 }
 0x623   :  { %2715 = vmatpush3.xpose.msk.msra.mxu1 %vm511_vm2, %v1411_v20  ;;  %2716 = vmatprep.mubr.msk.f32.mxu1 %vm3269_vm1, %v3268_v16 }
 0x624   :  { %2724 = vmatprep.subr.mxu1 %v3268_v16 }
 0x626   :  { %2717 = vmatmul.mubr.msk.f32.vlgmr.msra.gmra.mrb[16].mxu1 %vm511_vm2, %v1409_v29 }
 0x627   :  { %2726 = vmatprep.mubr.msk.f32.mxu1 %vm3269_vm1, %v3268_v16 }
 0x645   :  { %v992_v30 = vpop.xlane.xlu1 %991 }
 0x646   :  { %v996_v31 = vsub.f32 %v908_v15, %v992_v30 }
 0x648   :  { %v998_v32 = vmul.f32 1.442695, %v996_v31 }
 0x649   :  { %v1016_v33 = vpop.permute.xlu1 %1015 }
 0x64a   :  { %2877 = vpow2.f32 %v998_v32  ;;  %2690 = vmatpush3.msra.mxu0 %v1016_v33 }
 0x64b   :  { %2699 = vmatprep.subr.mxu0 %v508_v47 }
 0x654   :  { %v2878_v34 = vpop.eup %2877 }
 0x655   :  { %v1002_v35 = vsel %vm511_vm2, %v2878_v34, 0.0 }
 0x656   :  { %1003 = vadd.xlane.f32.xlu0 %v1002_v35 }
 0x6e3   :  { %v1004_v36 = vpop.xlane.xlu0 %1003 }
 0x6e4   :  { %2879 = vrcp.f32 %v1004_v36 }
 0x6ee   :  { %v2880_v37 = vpop.eup %2879 }
 0x6ef   :  { %v1010_v38 = vmul.f32 %v2880_v37, %v2878_v34 }
 0x6f1   :  { %2692 = vmatmul.mubr.msk.f32.vlgmr.msra.gmra.mrb[6].mxu0 %vm511_vm2, %v1010_v38  ;;  %v1164_v39 = vpop.f32.mrb[12].mxu1  ;;  %v1012_v4 = vadd.f32 %v1010_v38, %v3678_v1 }
 0x6f2   :  { %v2698_v40 = vpop.f32.mrb[13].mxu1  ;;  %2700 = vmatpush3.msra.mxu0 %v508_v47  ;;  %v510_v47 = vld [vmem:[%s3872_s9 + $0x18] sm:$0xff] }
 0x6f3   :  { %2704 = vmatprep.subr.mxu0 %v507_v49 }
 0x6f5   :  { %v1404_v41 = vpop.f32.mrb[14].mxu1 }
 0x6f6   :  { %v2713_v42 = vpop.f32.mrb[15].mxu1  ;;  %v1486_v43 = vsel %vm511_vm2, %v1404_v41, -inf }
 0x6f7   :  { %1487 = vmax.xlane.f32.xlu0 %v1486_v43 }
 0x6f9   :  { %v1482_v44 = vpop.f32.mrb[16].mxu1 }
 0x6fa   :  { %v2718_v45 = vpop.f32.mrb[17].mxu1  ;;  %v1489_v46 = vsel %vm511_vm2, %v1482_v44, -inf }
 0x6fb   :  { %1490 = vmax.xlane.f32.xlu0 %v1489_v46 }
 0x784   :  { %v1488_v51 = vpop.xlane.xlu0 %1487 }
 0x785   :  { %v1492_v52 = vsub.f32 %v1404_v41, %v1488_v51 }
 0x787   :  { %v1494_v53 = vmul.f32 1.442695, %v1492_v52 }
 0x788   :  { %v1491_v54 = vpop.xlane.xlu0 %1490 }
 0x789   :  { %2881 = vpow2.f32 %v1494_v53  ;;  %v1493_v55 = vsub.f32 %v1482_v44, %v1491_v54  ;;  %v2537_v53 = vld [vmem:[#allocation13] ss:$0 sm:$0xff] }
 0x78b   :  { %v1496_v56 = vmul.f32 1.442695, %v1493_v55 }
 0x78d   :  { %2883 = vpow2.f32 %v1496_v56 }
 0x793   :  { %v2882_v58 = vpop.eup %2881 }
 0x794   :  { %v1498_v59 = vsel %vm511_vm2, %v2882_v58, 0.0 }
 0x795   :  { %1499 = vadd.xlane.f32.xlu0 %v1498_v59 }
 0x797   :  { %v2884_v60 = vpop.eup %2883 }
 0x798   :  { %v1501_v61 = vsel %vm511_vm2, %v2884_v60, 0.0 }
 0x799   :  { %1502 = vadd.xlane.f32.xlu1 %v1501_v61 }
 0x7aa   :  { %1745 = vrot.lane.b32.xlu1 %v3611_v26, %s3272_s12 }
 0x7ab   :  { %1510 = vrot.lane.b32.xlu0 %v3649_v50, %s3271_s5 }
 0x7af   :  { %1586 = vrot.lane.b32.xlu0 %v3647_v48, %s3271_s5 }
 0x7b3   :  { %1747 = vrot.lane.b32.xlu0 %v3603_v24, %s3272_s12  ;;  %v509_v24 = vld [vmem:[%s3872_s9 + $0x10] sm:$0xff] }
 0x7b7   :  { %1825 = vrot.lane.b32.xlu0 %v3601_v21, %s3272_s12 }
 0x7bb   :  { %1823 = vrot.lane.b32.xlu0 %v3609_v25, %s3272_s12 }
 0x7c4   :  { %v1087_v62 = vpop.f32.mrb[6].mxu0 }
 0x7c5   :  { %v2693_v63 = vpop.f32.mrb[7].mxu0  ;;  %2701 = vmatprep.mubr.msk.f32.mxu0 %vm511_vm2, %v1087_v62 }
 0x7c6   :  { %2702 = vmatmul.mubr.msk.f32.vlgmr.msra.gmra.mrb[8].mxu0 %vm511_vm2, %v1164_v39 }
 0x7c7   :  { %2706 = vmatprep.mubr.msk.f32.mxu0 %vm511_vm2, %v3694_v12  ;;  %2705 = vmatpush3.msra.mxu0 %v507_v49 }
 0x7c8   :  { %2719 = vmatprep.subr.mxu0 %v3268_v16 }
 0x7ce   :  { %2707 = vmatmul.mubr.msk.f32.vlgmr.msra.gmra.mrb[8].mxu0 %vm511_vm2, %v3689_v3 }
 0x7cf   :  { %2721 = vmatprep.mubr.msk.f32.mxu0 %vm3269_vm1, %v3268_v16 }
 0x822   :  { %v1500_v21 = vpop.xlane.xlu0 %1499 }
 0x823   :  { %2885 = vrcp.f32 %v1500_v21 }
 0x826   :  { %v1503_v25 = vpop.xlane.xlu1 %1502  ;;  %v1511_v26 = vpop.permute.xlu0 %1510 }
 0x827   :  { %2887 = vrcp.f32 %v1503_v25  ;;  %2720 = vmatpush3.msra.mxu0 %v1511_v26 }
 0x828   :  { %2729 = vmatprep.subr.mxu0 %v509_v24 }
 0x82a   :  { %v1587_v0 = vpop.permute.xlu0 %1586  ;;  %v1746_v1 = vpop.permute.xlu1 %1745 }
 0x82b   :  { %2725 = vmatpush3.msra.mxu1 %v1587_v0 }
 0x82c   :  { %2734 = vmatprep.subr.mxu1 %v3268_v16 }
 0x82d   :  { %v2886_v2 = vpop.eup %2885 }
 0x82e   :  { %v1506_v3 = vmul.f32 %v2886_v2, %v2882_v58  ;;  %v1748_v9 = vpop.permute.xlu0 %1747 }
 0x830   :  { %2722 = vmatmul.mubr.msk.f32.vlgmr.msra.gmra.mrb[10].mxu0 %vm511_vm2, %v1506_v3  ;;  %v1508_v5 = vadd.f32 %v1506_v3, %v1012_v4  ;;  %v2218_v4 = vld [vmem:[#allocation20] sm:$0xff] }
 0x831   :  { %v2888_v6 = vpop.eup %2887  ;;  %2730 = vmatpush3.msra.mxu0 %v509_v24 }
 0x832   :  { %v1507_v7 = vmul.f32 %v2888_v6, %v2884_v60  ;;  %2739 = vmatprep.subr.mxu0 %v3268_v16  ;;  %v1826_v57 = vpop.permute.xlu0 %1825 }
 0x834   :  { %2727 = vmatmul.mubr.msk.f32.vlgmr.msra.gmra.mrb[18].mxu1 %vm511_vm2, %v1507_v7  ;;  %v1509_v10 = vadd.f32 %v1507_v7, %v1013_v8  ;;  %v2220_v7 = vld [vmem:[#allocation20 + $0x10] sm:$0xff]  ;;  %v2221_v8 = vld [vmem:[#allocation20 + $0x18] sm:$0xff] }
 0x835   :  { %2735 = vmatpush3.xpose.msk.msra.mxu1 %vm511_vm2, %v1748_v9  ;;  %2736 = vmatprep.mubr.msk.f32.mxu1 %vm3269_vm1, %v3268_v16  ;;  %v2817_v9 = vpack.c.bf16 %v2221_v8, %v2220_v7 }
 0x836   :  { %2744 = vmatprep.subr.mxu1 %v3268_v16  ;;  %v1824_v15 = vpop.permute.xlu0 %1823 }
 0x838   :  { %2737 = vmatmul.mubr.msk.f32.vlgmr.msra.gmra.mrb[20].mxu1 %vm511_vm2, %v1746_v1  ;;  %v2313_v1 = vld [vmem:[%s3880_s17 + $0x8] sm:$0xff] }
 0x839   :  { %2746 = vmatprep.mubr.msk.f32.mxu1 %vm3269_vm1, %v3268_v16 }
 0x903   :  { %v1582_v11 = vpop.f32.mrb[10].mxu0 }
 0x904   :  { %v2723_v12 = vpop.f32.mrb[11].mxu0  ;;  %2731 = vmatprep.mubr.msk.f32.mxu0 %vm511_vm2, %v1582_v11  ;;  %v2314_v11 = vld [vmem:[%s3880_s17 + $0x10] sm:$0xff] }
 0x907   :  { %v1658_v13 = vpop.f32.mrb[18].mxu1 }
 0x908   :  { %v2728_v14 = vpop.f32.mrb[19].mxu1  ;;  %2732 = vmatmul.mubr.msk.f32.vlgmr.msra.gmra.mrb[8].mxu0 %vm511_vm2, %v1658_v13 }
 0x909   :  { %2740 = vmatpush3.xpose.msk.msra.mxu0 %vm511_vm2, %v1826_v57  ;;  %2741 = vmatprep.mubr.msk.f32.mxu0 %vm3269_vm1, %v3268_v16  ;;  %v2315_v57 = vld [vmem:[%s3880_s17 + $0x18] sm:$0xff]  ;;  %v2316_v14 = vld [vmem:[%s3880_s17 + $0x20] sm:$0xff] }
 0x90a   :  { %2749 = vmatprep.subr.mxu0 %v3268_v16  ;;  %v2825_v13 = vpack.c.bf16 %v2315_v57, %v2314_v11 }
 0x90b   :  { %v1819_v17 = vpop.f32.mrb[20].mxu1 }
 0x90c   :  { %v2738_v18 = vpop.f32.mrb[21].mxu1  ;;  %2742 = vmatmul.mubr.msk.f32.vlgmr.msra.gmra.mrb[12].mxu0 %vm511_vm2, %v1824_v15  ;;  %v1901_v19 = vsel %vm511_vm2, %v1819_v17, -inf  ;;  %v2317_v15 = vld [vmem:[%s3880_s17 + $0x28] sm:$0xff] }
 0x90d   :  { %1902 = vmax.xlane.f32.xlu0 %v1901_v19  ;;  %2751 = vmatprep.mubr.msk.f32.mxu0 %vm3269_vm1, %v3268_v16 }
 0x99a   :  { %v1903_v20 = vpop.xlane.xlu0 %1902 }
 0x99b   :  { %v1907_v22 = vsub.f32 %v1819_v17, %v1903_v20  ;;  %v2829_v17 = vpack.c.bf16 %v2317_v15, %v2316_v14 }
 0x99d   :  { %v1909_v23 = vmul.f32 1.442695, %v1907_v22 }
 0x99f   :  { %2889 = vpow2.f32 %v1909_v23 }
 0x9a9   :  { %v2890_v27 = vpop.eup %2889 }
 0x9aa   :  { %v1913_v28 = vsel %vm511_vm2, %v2890_v27, 0.0 }
 0x9ab   :  { %1914 = vadd.xlane.f32.xlu0 %v1913_v28 }
 0x9df   :  { %v1897_v29 = vpop.f32.mrb[12].mxu0 }
 0x9e0   :  { %v2743_v30 = vpop.f32.mrb[13].mxu0  ;;  %v1904_v31 = vsel %vm511_vm2, %v1897_v29, -inf }
 0x9e1   :  { %1905 = vmax.xlane.f32.xlu1 %v1904_v31  ;;  %v2539_v31 = vld [vmem:[#allocation16] ss:$0 sm:$0xff] }
 0x9f2   :  { %2001 = vrot.lane.b32.xlu1 %v3647_v48, %s3272_s12 }
 0xa38   :  { %v1915_v32 = vpop.xlane.xlu0 %1914 }
 0xa39   :  { %2891 = vrcp.f32 %v1915_v32 }
 0xa43   :  { %v2892_v33 = vpop.eup %2891 }
 0xa44   :  { %v1921_v16 = vmul.f32 %v2892_v33, %v2890_v27 }
 0xa46   :  { %v1923_v34 = vadd.f32 %v1921_v16, %v1508_v5  ;;  %v2219_v5 = vld [vmem:[#allocation20 + $0x8] sm:$0xff] }
 0xa47   :  { %v2813_v6 = vpack.c.bf16 %v2219_v5, %v2218_v4 }
 0xa48   :  { %v2160_v35 = vmul.f32 0.25, %v1923_v34 }
 0xa4a   :  { %2162 = vst.msk [vmem:[#allocation24] sm:$0xff] %vm511_vm2, %v2160_v35 }
 0xa6e   :  { %v1906_v36 = vpop.xlane.xlu1 %1905 }
 0xa6f   :  { %v1908_v37 = vsub.f32 %v1897_v29, %v1906_v36  ;;  %v2538_v29 = vld [vmem:[#allocation14] ss:$0 sm:$0xff] }
 0xa71   :  { %v1911_v38 = vmul.f32 1.442695, %v1908_v37  ;;  %v2318_v37 = vld [vmem:[%s3880_s17 + $0x30] sm:$0xff] }
 0xa72   :  { %v2002_v39 = vpop.permute.xlu1 %2001 }
 0xa73   :  { %2893 = vpow2.f32 %v1911_v38  ;;  %2750 = vmatpush3.msra.mxu0 %v2002_v39  ;;  %v2319_v38 = vld [vmem:[%s3880_s17 + $0x38] sm:$0xff] }
 0xa74   :  { %2754 = vmatprep.subr.mxu0 %v510_v47  ;;  %v2833_v39 = vpack.c.bf16 %v2319_v38, %v2318_v37 }
 0xa7d   :  { %v2894_v40 = vpop.eup %2893 }
 0xa7e   :  { %v1916_v41 = vsel %vm511_vm2, %v2894_v40, 0.0 }
 0xa7f   :  { %1917 = vadd.xlane.f32.xlu0 %v1916_v41 }
 0xa95   :  { %1925 = vrot.lane.b32.xlu0 %v3649_v50, %s3272_s12 }
 0xb0c   :  { %v1918_v48 = vpop.xlane.xlu0 %1917 }
 0xb0d   :  { %2895 = vrcp.f32 %v1918_v48 }
 0xb10   :  { %v1926_v42 = vpop.permute.xlu0 %1925 }
 0xb11   :  { %2745 = vmatpush3.msra.mxu1 %v1926_v42 }
 0xb12   :  { %2747 = vmatmul.mubr.msk.f32.vlgmr.msra.gmra.mrb[22].mxu1 %vm511_vm2, %v1921_v16  ;;  %2814 = vmatprep.subr.bf16.mxu1 %v2813_v6 }
 0xb13   :  { %2816 = vmatpush3.bf16.msra.mxu1 %v2813_v6 }
 0xb14   :  { %2818 = vmatprep.subr.bf16.mxu1 %v2817_v9 }
 0xb17   :  { %v2896_v43 = vpop.eup %2895  ;;  %2820 = vmatpush3.bf16.msra.mxu1 %v2817_v9 }
 0xb18   :  { %v1922_v44 = vmul.f32 %v2896_v43, %v2894_v40  ;;  %v2540_v40 = vld [vmem:[#allocation22] ss:$0 sm:$0xff] }
 0xb1a   :  { %2752 = vmatmul.mubr.msk.f32.vlgmr.msra.gmra.mrb[14].mxu0 %vm511_vm2, %v1922_v44  ;;  %v1924_v45 = vadd.f32 %v1922_v44, %v1509_v10  ;;  %v2312_v10 = vld [vmem:[%s3880_s17] sm:$0xff]  ;;  %s3273_s17 = smov [#allocation24]  }
 0xb1b   :  { %2755 = vmatpush3.msra.mxu0 %v510_v47  ;;  %v2821_v12 = vpack.c.bf16 %v2313_v1, %v2312_v10 }
 0xb1c   :  { %v2161_v46 = vmul.f32 0.25, %v1924_v45 }
 0xb1d   :  { %2822 = vmatprep.subr.bf16.mxu0 %v2821_v12 }
 0xb1e   :  { %2163 = vst.msk [vmem:[#allocation24 + $0x8] sm:$0xff] %vm511_vm2, %v2161_v46  ;;  %v2543_v46 = vld [vmem:[%s3881_s18] ss:$0 sm:$0xff]  ;;  %s2474_s18 = sshll.u32 %s3273_s17, 4  ;;  %s2475_s18 = int_to_ptr.vmem [resolvable:$true] %s2474_s18 }
 0xb1f   :  { %s3191_s28 = scalar_lea.vmem %s2475_s18, 256  ;;  %p3196_p7 = scmp.lt.s32.totalorder %s2475_s18, %s2475_s18 }
 0xb20   :  { %p3192_p6 = scmp.ne.s32.totalorder %s2475_s18, %s3191_s28  ;;  %p3197_p8 = scmp.lt.s32.totalorder %s3191_s28, %s3191_s28 }
 0xb22   :  { %p3198_p9 = por %p3197_p8, %p3196_p7 }
 0xb24   :  { %p3199_p10 = pnand %p3198_p9, %p3192_p6 }
 0xbe5   :  { %v1997_v50 = vpop.f32.mrb[22].mxu1 }
 0xbe6   :  { %v2748_v49 = vpop.f32.mrb[23].mxu1  ;;  %2756 = vmatprep.mubr.msk.f32.mxu0 %vm511_vm2, %v1997_v50 }
 0xbed   :  { %v2073_v51 = vpop.f32.mrb[14].mxu0 }
 0xbee   :  { %v2753_v52 = vpop.f32.mrb[15].mxu0  ;;  %2757 = vmatmul.mubr.msk.f32.vlgmr.msra.gmra.mrb[8].mxu0 %vm511_vm2, %v2073_v51 }
 0xbef   :  { %2824 = vmatpush3.bf16.msra.mxu0 %v2821_v12 }
 0xbf0   :  { %2826 = vmatprep.subr.bf16.mxu0 %v2825_v13 }
 0xbf3   :  { %2828 = vmatpush3.bf16.msra.mxu0 %v2825_v13 }
 0xbf4   :  { %2830 = vmatprep.subr.bf16.mxu0 %v2829_v17 }
 0xbf7   :  { %2832 = vmatpush3.bf16.msra.mxu0 %v2829_v17 }
 0xbf8   :  { %2834 = vmatprep.subr.bf16.mxu0 %v2833_v39 }
 0xbfb   :  { %2836 = vmatpush3.bf16.msra.mxu0 %v2833_v39 }
 0xcc1   :  { %v2758_v54 = vpop.f32.mrb[8].mxu0 }
 0xcc2   :  { %v2172_v55 = vadd.f32 %v2758_v54, %v2537_v53  ;;  %v2149_v56 = vpop.f32.mrb[9].mxu0 }
 0xcc3   :  { %v2171_v58 = vadd.f32 %v2537_v53, %v2149_v56 }
 0xcc4   :  { %v2176_v59 = vsel %vm241_vm0, %v2172_v55, 0.0 }
 0xcc5   :  { %2177 = vadd.xlane.f32.xlu1 %v2176_v59  ;;  %v2173_v60 = vsel %vm241_vm0, %v2171_v58, 0.0 }
 0xcc6   :  { %2174 = vadd.xlane.f32.xlu0 %v2173_v60 }
 0xd52   :  { %v2178_v61 = vpop.xlane.xlu1 %2177 }
 0xd53   :  { %v2181_v62 = vmul.f32 0.03125, %v2178_v61  ;;  %v2175_v63 = vpop.xlane.xlu0 %2174 }
 0xd54   :  { %v2180_v21 = vmul.f32 0.03125, %v2175_v63 }
 0xd55   :  { %v2183_v24 = vsub.f32 %v2172_v55, %v2181_v62 }
 0xd56   :  { %v2182_v25 = vsub.f32 %v2171_v58, %v2180_v21 }
 0xd57   :  { %v2185_v2 = vmul.f32 %v2183_v24, %v2183_v24 }
 0xd58   :  { %v2184_v26 = vmul.f32 %v2182_v25, %v2182_v25 }
 0xd59   :  { %v2189_v3 = vsel %vm241_vm0, %v2185_v2, 0.0 }
 0xd5a   :  { %v2186_v0 = vsel %vm241_vm0, %v2184_v26, 0.0 }
 0xd5b   :  { %2187 = vadd.xlane.f32.xlu0 %v2186_v0 }
 0xd5f   :  { %2190 = vadd.xlane.f32.xlu0 %v2189_v3 }
 0xde8   :  { %v2188_v18 = vpop.xlane.xlu0 %2187 }
 0xde9   :  { %v2192_v19 = vmul.f32 0.03125, %v2188_v18 }
 0xdeb   :  { %v2194_v20 = vadd.f32 1e-05, %v2192_v19 }
 0xdec   :  { %v2191_v22 = vpop.xlane.xlu0 %2190 }
 0xded   :  { %2897 = vrsqrt.f32 %v2194_v20  ;;  %v2193_v23 = vmul.f32 0.03125, %v2191_v22 }
 0xdef   :  { %v2195_v27 = vadd.f32 1e-05, %v2193_v23 }
 0xdf1   :  { %2899 = vrsqrt.f32 %v2195_v27 }
 0xdf7   :  { %v2898_v28 = vpop.eup %2897 }
 0xdf8   :  { %v2198_v30 = vmul.f32 %v2898_v28, %v2182_v25 }
 0xdfa   :  { %v2207_v32 = vmul.f32 %v2538_v29, %v2198_v30 }
 0xdfb   :  { %v2900_v33 = vpop.eup %2899 }
 0xdfc   :  { %v2199_v16 = vmul.f32 %v2900_v33, %v2183_v24  ;;  %v2216_v34 = vadd.f32 %v2539_v31, %v2207_v32 }
 0xdfe   :  { %v2208_v35 = vmul.f32 %v2538_v29, %v2199_v16  ;;  %2767 = vmatprep.mubr.msk.f32.mxu1 %vm241_vm0, %v2216_v34 }
 0xe00   :  { %v2217_v36 = vadd.f32 %v2539_v31, %v2208_v35 }
 0xe02   :  { %2768 = vmatmul.mubr.msk.f32.vlgmr.msra.gmra.mrb[24].mxu1 %vm241_vm0, %v2217_v36 }
 0xed5   :  { %v2769_v41 = vpop.f32.mrb[24].mxu1 }
 0xed6   :  { %v2307_v48 = vadd.f32 %v2769_v41, %v2540_v40  ;;  %v2301_v42 = vpop.f32.mrb[25].mxu1 }
 0xed7   :  { %v2302_v43 = vadd.f32 %v2540_v40, %v2301_v42 }
 0xed8   :  { %v2311_v45 = vmax.f32 %v2307_v48, 0.0 }
 0xed9   :  { %v2310_v44 = vmax.f32 %v2302_v43, 0.0 }
 0xedb   :  { %2786 = vmatprep.mubr.msk.f32.mxu0 %vm2327_vm3, %v2310_v44 }
 0xedc   :  { %2787 = vmatmul.mubr.msk.f32.vlgmr.msra.gmra.mrb[16].mxu0 %vm2327_vm3, %v2311_v45 }
 0xfaf   :  { %v2788_v47 = vpop.f32.mrb[16].mxu0 }
 0xfb0   :  { %v2406_v50 = vadd.f32 %v2788_v47, %v2543_v46  ;;  %v2400_v49 = vpop.f32.mrb[17].mxu0 }
 0xfb1   :  { %v2401_v51 = vadd.f32 %v2543_v46, %v2400_v49 }
 0xfb2   :  { %v2410_v52 = vadd.f32 %v2406_v50, %v2217_v36 }
 0xfb3   :  { %v2409_v53 = vadd.f32 %v2401_v51, %v2216_v34 }
 0xfb4   :  { %v2414_v54 = vsel %vm241_vm0, %v2410_v52, 0.0 }
 0xfb5   :  { %2415 = vadd.xlane.f32.xlu1 %v2414_v54  ;;  %v2411_v55 = vsel %vm241_vm0, %v2409_v53, 0.0 }
 0xfb6   :  { %2412 = vadd.xlane.f32.xlu0 %v2411_v55 }
0x1042   :  { %v2416_v56 = vpop.xlane.xlu1 %2415 }
0x1043   :  { %v2418_v58 = vmul.f32 0.03125, %v2416_v56  ;;  %v2413_v59 = vpop.xlane.xlu0 %2412 }
0x1044   :  { %v2417_v60 = vmul.f32 0.03125, %v2413_v59 }
0x1045   :  { %v2420_v61 = vsub.f32 %v2410_v52, %v2418_v58 }
0x1046   :  { %v2419_v62 = vsub.f32 %v2409_v53, %v2417_v60 }
0x1047   :  { %v2422_v63 = vmul.f32 %v2420_v61, %v2420_v61 }
0x1048   :  { %v2421_v21 = vmul.f32 %v2419_v62, %v2419_v62 }
0x1049   :  { %v2426_v24 = vsel %vm241_vm0, %v2422_v63, 0.0 }
0x104a   :  { %2427 = vadd.xlane.f32.xlu1 %v2426_v24  ;;  %v2423_v25 = vsel %vm241_vm0, %v2421_v21, 0.0 }
0x104b   :  { %2424 = vadd.xlane.f32.xlu0 %v2423_v25 }
0x104c   :  { %3202 = shalt.err (!%p3199_p10)
}
0x104d   :  { %s3203_s11 = scalar_lea.hbm %s3883_s20, 256 }
0x104e   :  { %p3204_p11 = scmp.ne.s32.totalorder %s3883_s20, %s3203_s11  ;;  %p3207_p12 = scmp.lt.u32.totalorder %s3203_s11, %s3883_s20 }
0x1050   :  { %p3209_p13 = pnand %p3207_p12, %p3204_p11 }
0x1052   :  { %3212 = shalt.err (!%p3209_p13)
}
0x1053   :  { %2480 = dma.vmem_to_hbm [thread:$0]  %s2475_s18, 256, %s3883_s20, [#allocation25], %s3897_s13, %s3897_s13, %s3256_s21   ;;  %v2546_v7 = vld [vmem:[#allocation17] ss:$0 sm:$0xff]  ;;  %v2547_v1 = vld [vmem:[#allocation19] ss:$0 sm:$0xff] }
0x1054   :  { %s3274_s10 = smov [#allocation23]  }
0x1055   :  { %s2462_s15 = sshll.u32 %s3274_s10, 4  ;;  %s2463_s15 = int_to_ptr.vmem [resolvable:$true] %s2462_s15 }
0x1056   :  { %s3213_s20 = scalar_lea.vmem %s2463_s15, 256  ;;  %p3218_p1 = scmp.lt.s32.totalorder %s2463_s15, %s2463_s15 }
0x1057   :  { %p3214_p0 = scmp.ne.s32.totalorder %s2463_s15, %s3213_s20  ;;  %p3219_p2 = scmp.lt.s32.totalorder %s3213_s20, %s3213_s20 }
0x1059   :  { %p3220_p3 = por %p3219_p2, %p3218_p1 }
0x105b   :  { %p3221_p4 = pnand %p3220_p3, %p3214_p0 }
0x10d7   :  { %v2428_v26 = vpop.xlane.xlu1 %2427 }
0x10d8   :  { %v2430_v0 = vmul.f32 0.03125, %v2428_v26  ;;  %v2425_v2 = vpop.xlane.xlu0 %2424 }
0x10d9   :  { %v2429_v3 = vmul.f32 0.03125, %v2425_v2 }
0x10da   :  { %v2432_v4 = vadd.f32 1e-05, %v2430_v0 }
0x10db   :  { %v2431_v5 = vadd.f32 1e-05, %v2429_v3 }
0x10dc   :  { %2901 = vrsqrt.f32 %v2432_v4 }
0x10dd   :  { %2903 = vrsqrt.f32 %v2431_v5 }
0x10e6   :  { %v2902_v6 = vpop.eup %2901 }
0x10e7   :  { %v2904_v8 = vpop.eup %2903  ;;  %v2436_v9 = vmul.f32 %v2902_v6, %v2420_v61 }
0x10e8   :  { %v2435_v10 = vmul.f32 %v2904_v8, %v2419_v62 }
0x10e9   :  { %v2445_v11 = vmul.f32 %v2546_v7, %v2436_v9 }
0x10ea   :  { %v2444_v12 = vmul.f32 %v2546_v7, %v2435_v10 }
0x10eb   :  { %v2454_v57 = vadd.f32 %v2547_v1, %v2445_v11 }
0x10ec   :  { %v2453_v13 = vadd.f32 %v2547_v1, %v2444_v12 }
0x10ed   :  { %2456 = vst.msk [vmem:[#allocation23 + $0x8] sm:$0xff] %vm241_vm0, %v2454_v57 }
0x10ee   :  { %2455 = vst.msk [vmem:[#allocation23] sm:$0xff] %vm241_vm0, %v2453_v13 }
0x10ef   :  { %3224 = shalt.err (!%p3221_p4)
}
0x10f0   :  { %s3225_s27 = scalar_lea.hbm %s3882_s19, 256 }
0x10f1   :  { %p3226_p5 = scmp.ne.s32.totalorder %s3882_s19, %s3225_s27  ;;  %p3229_p6 = scmp.lt.u32.totalorder %s3225_s27, %s3882_s19 }
0x10f3   :  { %p3231_p7 = pnand %p3229_p6, %p3226_p5 }
0x10f5   :  { %3234 = shalt.err (!%p3231_p7)
}
0x10f6   :  { %2468 = dma.vmem_to_hbm [thread:$0]  %s2463_s15, 256, %s3882_s19, [#allocation4], %s3897_s13, %s3897_s13, %s3256_s21  }
0x10f7   :  { %3249 = dma.done.wait [#allocation4], 256  }
0x10f8   :  { %3250 = vsyncadd [#allocation4], 4294967040 }
0x10f9   :  { %3251 = dma.done.wait [#allocation25], 256  }
0x10fa   :  { %3252 = vsyncadd [#allocation25], 4294967040 }
0x10fb   :  { %2487 = vsyncpa [#allocation3], 1 }
0x10fc   :  { %2488 = vsyncpa [#allocation6], 1 }
0x10fd   :  { %2489 = vsyncpa [#allocation9], 1 }
0x10fe   :  { %2490 = vsyncpa [#allocation12], 1 }
0x10ff   :  { %2491 = vsyncpa [#allocation15], 1 }
0x1100   :  { %2492 = vsyncpa [#allocation18], 1 }
0x1101   :  { %2493 = vsyncpa [#allocation21], 1 }
0x1102   :  { %2494 = vsyncpa [#allocation4], 1 }
0x1103   :  { %2495 = vsyncpa [#allocation25], 1 }

</bundles_post_ra>
